<compile_context>
chip_gen: v5e
topology: v5e:2x2
jax: 0.10.0
libtpu: 0.0.40
codegen_flags: <defaults>
</compile_context>

<pallas_src>
import math

import jax
import jax.numpy as jnp
from jax.experimental import pallas as pl
from jax.experimental.pallas import tpu as pltpu

D_MODEL = 32
N_HEADS = 4
FF_MULT = 4
CONV_K = 7
LN_EPS = 1e-5
BN_EPS = 1e-5

# Row indices into the packed [N_VEC_D, D] vector table.
(IDX_LN1_G, IDX_LN1_B, IDX_LNA_G, IDX_LNA_B, IDX_LNC_G, IDX_LNC_B,
 IDX_LN2_G, IDX_LN2_B, IDX_LNO_G, IDX_LNO_B, IDX_B1B, IDX_BO, IDX_BDW,
 IDX_BN_SCALE, IDX_BN_SHIFT, IDX_BPC2, IDX_B2B, IDX_WDW0) = range(18)
N_VEC_D = IDX_WDW0 + CONV_K  # 24

# Row indices into the packed [N_VEC_W, D*FF_MULT] wide-vector table.
IDXW_B1A, IDXW_B2A, IDXW_BPC1, IDXW_BQKV = range(4)
N_VEC_W = 4


def conformer_kernel(x_ref, vd_ref, vw_ref, wffa_ref, wffb_ref,
                     wqkv_ref, wpc1_ref, woc2_ref, o_ref):
    b_blk, T, D = x_ref.shape
    M = b_blk * T
    HD = D // N_HEADS

    def vd(i):                                    # [1, D] packed param row
        return vd_ref[pl.ds(i, 1), :]

    def vw(i, n):                                 # [1, n] packed wide row
        return vw_ref[pl.ds(i, 1), pl.ds(0, n)]

    def layernorm(v, gi, bi):
        mu = jnp.mean(v, axis=-1, keepdims=True)
        var = jnp.mean((v - mu) ** 2, axis=-1, keepdims=True)
        return (v - mu) * jax.lax.rsqrt(var + LN_EPS) * vd(gi) + vd(bi)

    def ffn(v, wa, ba, wb, bb):
        h = jnp.dot(v, wa, preferred_element_type=jnp.float32) + ba
        h = jnp.maximum(h, 0.0)
        return jnp.dot(h, wb, preferred_element_type=jnp.float32) + bb

    # (B_blk, T, D) -> (B_blk*T, D): leading-dim collapse, layout-free.
    x = x_ref[...].reshape(M, D).astype(jnp.float32)

    # ---- Macaron FeedForward 1 (half-step residual) ----
    # TODO(synk): nn.Dropout is stochastic; treated as identity (eval mode).
    h = layernorm(x, IDX_LN1_G, IDX_LN1_B)
    x = x + 0.5 * ffn(h, wffa_ref[0], vw(IDXW_B1A, FF_MULT * D),
                      wffb_ref[0], vd(IDX_B1B))

    # ---- Multi-head self-attention ----
    xn = layernorm(x, IDX_LNA_G, IDX_LNA_B)
    qkv = jnp.dot(xn, wqkv_ref[...], preferred_element_type=jnp.float32)
    qkv = qkv + vw(IDXW_BQKV, 3 * D)
    scale = 1.0 / math.sqrt(HD)
    wo = woc2_ref[0]                               # [D, D]
    attn = jnp.zeros((M, D), jnp.float32)
    for hh in range(N_HEADS):
        lo = hh * HD
        q_h = qkv[:, lo:lo + HD].reshape(b_blk, T, HD)
        k_h = qkv[:, D + lo:D + lo + HD].reshape(b_blk, T, HD)
        v_h = qkv[:, 2 * D + lo:2 * D + lo + HD].reshape(b_blk, T, HD)
        s = jnp.einsum('bqd,bkd->bqk', q_h, k_h,
                       preferred_element_type=jnp.float32) * scale
        s = s - jnp.max(s, axis=-1, keepdims=True)
        e = jnp.exp(s)
        p = e * pl.reciprocal(jnp.sum(e, axis=-1, keepdims=True), approx=True)
        o_h = jnp.einsum('bqk,bkd->bqd', p, v_h,
                         preferred_element_type=jnp.float32).reshape(M, HD)
        # Fold the output projection in per head (avoids lane-axis concat).
        attn = attn + jnp.dot(o_h, wo[lo:lo + HD, :],
                              preferred_element_type=jnp.float32)
    x = x + attn + vd(IDX_BO)

    # ---- Convolution module ----
    residual = x
    xc = layernorm(x, IDX_LNC_G, IDX_LNC_B)
    pc1 = jnp.dot(xc, wpc1_ref[...], preferred_element_type=jnp.float32)
    pc1 = pc1 + vw(IDXW_BPC1, 2 * D)
    g = pc1[:, :D] * jax.nn.sigmoid(pc1[:, D:])    # GLU
    # Depthwise conv (kernel=CONV_K, 'same' zero padding) via sublane rolls on
    # the fused slab + per-row time masks. The mask zeroes anything that would
    # cross a sequence (or slab wrap-around) boundary, so fused sequences
    # never mix.
    t_loc = jax.lax.broadcasted_iota(jnp.int32, (M, D), 0) % T
    y = jnp.zeros((M, D), jnp.float32)
    for kk in range(CONV_K):
        off = kk - CONV_K // 2
        shifted = g if off == 0 else pltpu.roll(g, (-off) % M, axis=0)
        valid = jnp.logical_and(t_loc + off >= 0, t_loc + off < T)
        y = y + jnp.where(valid, shifted, 0.0) * vd(IDX_WDW0 + kk)
    y = y + vd(IDX_BDW)
    # BatchNorm1d eval-mode affine (running stats folded host-side).
    # TODO(synk): training-mode BatchNorm batch statistics not implemented.
    y = y * vd(IDX_BN_SCALE) + vd(IDX_BN_SHIFT)
    y = jnp.maximum(y, 0.0)
    y = jnp.dot(y, woc2_ref[1], preferred_element_type=jnp.float32) + vd(IDX_BPC2)
    x = residual + y

    # ---- Macaron FeedForward 2 (half-step residual) ----
    h = layernorm(x, IDX_LN2_G, IDX_LN2_B)
    x = x + 0.5 * ffn(h, wffa_ref[1], vw(IDXW_B2A, FF_MULT * D),
                      wffb_ref[1], vd(IDX_B2B))

    # ---- final LayerNorm ----
    x = layernorm(x, IDX_LNO_G, IDX_LNO_B)
    o_ref[...] = x.reshape(b_blk, T, D).astype(o_ref.dtype)


def _pack_params(p):
    """Pack 34 tiny parameter tensors into 7 stacked inputs."""
    wide = p["b1a"].shape[1]                       # D * FF_MULT
    bn_scale = p["bn_g"] * (1.0 / math.sqrt(1.0 + BN_EPS))   # eval-mode BN
    bn_shift = p["bn_b"]
    vecs_d = jnp.concatenate([
        p["ln1_g"], p["ln1_b"], p["lna_g"], p["lna_b"],
        p["lnc_g"], p["lnc_b"], p["ln2_g"], p["ln2_b"],
        p["lno_g"], p["lno_b"],
        p["b1b"], p["bo"], p["bdw"],
        bn_scale, bn_shift, p["bpc2"], p["b2b"],
        p["wdw"],
    ], axis=0)                                     # [N_VEC_D, D]

    def pad_wide(v):
        return jnp.pad(v, ((0, 0), (0, wide - v.shape[1])))

    bqkv = jnp.concatenate([p["bq"], p["bk"], p["bv"]], axis=1)
    vecs_w = jnp.concatenate([
        p["b1a"], p["b2a"], pad_wide(p["bpc1"]), pad_wide(bqkv),
    ], axis=0)                                     # [N_VEC_W, wide]

    w_ffa = jnp.stack([p["w1a"], p["w2a"]])        # [2, D, 4D]
    w_ffb = jnp.stack([p["w1b"], p["w2b"]])        # [2, 4D, D]
    w_qkv = jnp.concatenate([p["wq"], p["wk"], p["wv"]], axis=1)  # [D, 3D]
    w_pc1 = p["wpc1"]                              # [D, 2D]
    w_oc2 = jnp.stack([p["wo"], p["wpc2"]])        # [2, D, D]
    return vecs_d, vecs_w, w_ffa, w_ffb, w_qkv, w_pc1, w_oc2


def _largest_divisor_leq(n, cap):
    cap = max(1, min(n, cap))
    for d in range(cap, 0, -1):
        if n % d == 0:
            return d
    return 1


def _pick_batch_block(B, T, target_rows=256):
    """Fuse batch elements so each grid step carries a tall [B_blk*T, D] slab."""
    bb = _largest_divisor_leq(B, max(1, target_rows // max(T, 1)))
    # Prefer >=2 grid steps (megacore sharding) when each step would still
    # carry a reasonably tall slab.
    if B // bb < 2:
        for cand in range(bb // 2, 0, -1):
            if B % cand == 0 and cand * T >= 128:
                bb = cand
                break
    return bb


@jax.jit
def conformer_block(x, params):
    B, T, D = x.shape
    packed = _pack_params(params)
    b_blk = _pick_batch_block(B, T)

    def full_spec(arr):
        zeros = (0,) * arr.ndim
        return pl.BlockSpec(arr.shape, lambda b: zeros)

    in_specs = [pl.BlockSpec((b_blk, T, D), lambda b: (b, 0, 0))]
    in_specs += [full_spec(a) for a in packed]
    out_spec = pl.BlockSpec((b_blk, T, D), lambda b: (b, 0, 0))

    return pl.pallas_call(
        conformer_kernel,
        out_shape=jax.ShapeDtypeStruct((B, T, D), x.dtype),
        grid_spec=pltpu.PrefetchScalarGridSpec(
            num_scalar_prefetch=0,
            grid=(B // b_blk,),
            in_specs=in_specs,
            out_specs=out_spec,
        ),
        compiler_params=pltpu.CompilerParams(dimension_semantics=("parallel",)),
    )(x, *packed)


# ------------------------- pure-JAX reference -------------------------
def conformer_ref(x, p):
    def ln(v, g, b):
        mu = v.mean(-1, keepdims=True)
        var = ((v - mu) ** 2).mean(-1, keepdims=True)
        return (v - mu) / jnp.sqrt(var + LN_EPS) * g[0] + b[0]

    B, T, D = x.shape
    HD = D // N_HEADS

    h = ln(x, p["ln1_g"], p["ln1_b"])
    h = jnp.maximum(h @ p["w1a"] + p["b1a"][0], 0.0)
    h = h @ p["w1b"] + p["b1b"][0]
    x = x + 0.5 * h

    xn = ln(x, p["lna_g"], p["lna_b"])
    q = (xn @ p["wq"] + p["bq"][0]).reshape(B, T, N_HEADS, HD)
    k = (xn @ p["wk"] + p["bk"][0]).reshape(B, T, N_HEADS, HD)
    v = (xn @ p["wv"] + p["bv"][0]).reshape(B, T, N_HEADS, HD)
    s = jnp.einsum("bthd,bshd->bhts", q, k) / math.sqrt(HD)
    pw = jax.nn.softmax(s, axis=-1)
    attn = jnp.einsum("bhts,bshd->bthd", pw, v).reshape(B, T, D)
    x = x + (attn @ p["wo"] + p["bo"][0])

    residual = x
    xc = ln(x, p["lnc_g"], p["lnc_b"])
    pc1 = xc @ p["wpc1"] + p["bpc1"][0]
    g = pc1[..., :D] * jax.nn.sigmoid(pc1[..., D:])
    gp = jnp.pad(g, ((0, 0), (CONV_K // 2, CONV_K // 2), (0, 0)))
    y = jnp.zeros_like(g)
    for kk in range(CONV_K):
        y = y + gp[:, kk:kk + T, :] * p["wdw"][kk][None, None, :]
    y = y + p["bdw"][0]
    y = y * (p["bn_g"][0] / math.sqrt(1.0 + BN_EPS)) + p["bn_b"][0]
    y = jnp.maximum(y, 0.0)
    y = y @ p["wpc2"] + p["bpc2"][0]
    x = residual + y

    h = ln(x, p["ln2_g"], p["ln2_b"])
    h = jnp.maximum(h @ p["w2a"] + p["b2a"][0], 0.0)
    h = h @ p["w2b"] + p["b2b"][0]
    x = x + 0.5 * h
    return ln(x, p["lno_g"], p["lno_b"])


def init_params(key, d=D_MODEL, ff=FF_MULT):
    keys = iter(jax.random.split(key, 40))

    def mat(shape, scale=0.1):
        return jax.random.normal(next(keys), shape, jnp.float32) * scale

    p = {}
    # FF1
    p["ln1_g"] = 1.0 + mat((1, d), 0.05); p["ln1_b"] = mat((1, d), 0.05)
    p["w1a"] = mat((d, d * ff)); p["b1a"] = mat((1, d * ff))
    p["w1b"] = mat((d * ff, d)); p["b1b"] = mat((1, d))
    # attention
    p["lna_g"] = 1.0 + mat((1, d), 0.05); p["lna_b"] = mat((1, d), 0.05)
    for n in ("wq", "wk", "wv", "wo"):
        p[n] = mat((d, d))
    for n in ("bq", "bk", "bv", "bo"):
        p[n] = mat((1, d))
    # conv module
    p["lnc_g"] = 1.0 + mat((1, d), 0.05); p["lnc_b"] = mat((1, d), 0.05)
    p["wpc1"] = mat((d, 2 * d)); p["bpc1"] = mat((1, 2 * d))
    p["wdw"] = mat((CONV_K, d)); p["bdw"] = mat((1, d))
    p["bn_g"] = 1.0 + mat((1, d), 0.05); p["bn_b"] = mat((1, d), 0.05)
    p["wpc2"] = mat((d, d)); p["bpc2"] = mat((1, d))
    # FF2
    p["ln2_g"] = 1.0 + mat((1, d), 0.05); p["ln2_b"] = mat((1, d), 0.05)
    p["w2a"] = mat((d, d * ff)); p["b2a"] = mat((1, d * ff))
    p["w2b"] = mat((d * ff, d)); p["b2b"] = mat((1, d))
    # final LN
    p["lno_g"] = 1.0 + mat((1, d), 0.05); p["lno_b"] = mat((1, d), 0.05)
    return p


if __name__ == "__main__":
    key = jax.random.PRNGKey(0)
    k_x, k_p = jax.random.split(key)
    B, T = 2, 8
    x = jax.random.normal(k_x, (B, T, D_MODEL), jnp.float32)
    params = init_params(k_p)

    out = jax.block_until_ready(conformer_block(x, params))
    ref = conformer_ref(x, params)
    assert out.shape == (B, T, D_MODEL)
    err = float(jnp.max(jnp.abs(out - ref)))
    # Slightly looser tolerance: softmax uses the EUP approximate reciprocal.
    assert jnp.allclose(out, ref, atol=5e-3, rtol=5e-3), err
    print("KERNEL_OK")
</pallas_src>

<mosaic_0001>
module attributes {stable_mosaic.version = 11 : i64} {
  func.func @conformer_kernel(%arg0: i32, %arg1: memref<2x8x32xf32, #tpu.memory_space<vmem>>, %arg2: memref<24x32xf32, #tpu.memory_space<vmem>>, %arg3: memref<4x128xf32, #tpu.memory_space<vmem>>, %arg4: memref<2x32x128xf32, #tpu.memory_space<vmem>>, %arg5: memref<2x128x32xf32, #tpu.memory_space<vmem>>, %arg6: memref<32x96xf32, #tpu.memory_space<vmem>>, %arg7: memref<32x64xf32, #tpu.memory_space<vmem>>, %arg8: memref<2x32x32xf32, #tpu.memory_space<vmem>>, %arg9: memref<2x8x32xf32, #tpu.memory_space<vmem>>) attributes {dimension_semantics = [#tpu.dimension_semantics<parallel>], iteration_bounds = array<i64: 1>, scalar_prefetch = 0 : i64, scratch_operands = 0 : i64, tpu.core_type = #tpu.core_type<tc>, window_params = [{transform_indices = @transform_0, window_bounds = array<i64: 2, 8, 32>}, {pipeline_mode = #tpu.pipeline_mode<synchronous>, transform_indices = @transform_1, window_bounds = array<i64: 24, 32>}, {pipeline_mode = #tpu.pipeline_mode<synchronous>, transform_indices = @transform_2, window_bounds = array<i64: 4, 128>}, {pipeline_mode = #tpu.pipeline_mode<synchronous>, transform_indices = @transform_3, window_bounds = array<i64: 2, 32, 128>}, {pipeline_mode = #tpu.pipeline_mode<synchronous>, transform_indices = @transform_4, window_bounds = array<i64: 2, 128, 32>}, {pipeline_mode = #tpu.pipeline_mode<synchronous>, transform_indices = @transform_5, window_bounds = array<i64: 32, 96>}, {pipeline_mode = #tpu.pipeline_mode<synchronous>, transform_indices = @transform_6, window_bounds = array<i64: 32, 64>}, {pipeline_mode = #tpu.pipeline_mode<synchronous>, transform_indices = @transform_7, window_bounds = array<i64: 2, 32, 32>}, {transform_indices = @transform_8, window_bounds = array<i64: 2, 8, 32>}]} {
    %c0 = arith.constant 0 : index
    %c0_0 = arith.constant 0 : index
    %c0_1 = arith.constant 0 : index
    %0 = vector.load %arg1[%c0, %c0_0, %c0_1] : memref<2x8x32xf32, #tpu.memory_space<vmem>>, vector<2x8x32xf32>
    %1 = vector.shape_cast %0 : vector<2x8x32xf32> to vector<16x32xf32>
    %cst = arith.constant dense<0.000000e+00> : vector<16xf32>
    %2 = vector.multi_reduction <add>, %1, %cst [1] : vector<16x32xf32> to vector<16xf32>
    %3 = vector.shape_cast %2 : vector<16xf32> to vector<16x1xf32>
    %cst_2 = arith.constant 3.200000e+01 : f32
    %4 = vector.broadcast %cst_2 : f32 to vector<16x1xf32>
    %5 = arith.divf %3, %4 : vector<16x1xf32>
    %6 = vector.broadcast %5 : vector<16x1xf32> to vector<16x32xf32>
    %7 = arith.subf %1, %6 : vector<16x32xf32>
    %8 = arith.mulf %7, %7 : vector<16x32xf32>
    %cst_3 = arith.constant dense<0.000000e+00> : vector<16xf32>
    %9 = vector.multi_reduction <add>, %8, %cst_3 [1] : vector<16x32xf32> to vector<16xf32>
    %10 = vector.shape_cast %9 : vector<16xf32> to vector<16x1xf32>
    %cst_4 = arith.constant 3.200000e+01 : f32
    %11 = vector.broadcast %cst_4 : f32 to vector<16x1xf32>
    %12 = arith.divf %10, %11 : vector<16x1xf32>
    %13 = vector.broadcast %5 : vector<16x1xf32> to vector<16x32xf32>
    %14 = arith.subf %1, %13 : vector<16x32xf32>
    %cst_5 = arith.constant 9.99999974E-6 : f32
    %15 = vector.broadcast %cst_5 : f32 to vector<16x1xf32>
    %16 = arith.addf %12, %15 : vector<16x1xf32>
    %17 = math.rsqrt %16 : vector<16x1xf32>
    %18 = vector.broadcast %17 : vector<16x1xf32> to vector<16x32xf32>
    %19 = arith.mulf %14, %18 : vector<16x32xf32>
    %c0_6 = arith.constant 0 : index
    %c0_7 = arith.constant 0 : index
    %20 = vector.load %arg2[%c0_6, %c0_7] : memref<24x32xf32, #tpu.memory_space<vmem>>, vector<1x32xf32>
    %21 = vector.broadcast %20 : vector<1x32xf32> to vector<16x32xf32>
    %22 = arith.mulf %19, %21 : vector<16x32xf32>
    %c1 = arith.constant 1 : index
    %c0_8 = arith.constant 0 : index
    %23 = vector.load %arg2[%c1, %c0_8] : memref<24x32xf32, #tpu.memory_space<vmem>>, vector<1x32xf32>
    %24 = vector.broadcast %23 : vector<1x32xf32> to vector<16x32xf32>
    %25 = arith.addf %22, %24 : vector<16x32xf32>
    %c0_9 = arith.constant 0 : index
    %c0_10 = arith.constant 0 : index
    %c0_11 = arith.constant 0 : index
    %26 = vector.load %arg4[%c0_9, %c0_10, %c0_11] : memref<2x32x128xf32, #tpu.memory_space<vmem>>, vector<1x32x128xf32>
    %27 = vector.shape_cast %26 : vector<1x32x128xf32> to vector<32x128xf32>
    %c0_12 = arith.constant 0 : index
    %c0_13 = arith.constant 0 : index
    %28 = vector.load %arg3[%c0_12, %c0_13] : memref<4x128xf32, #tpu.memory_space<vmem>>, vector<1x128xf32>
    %c0_14 = arith.constant 0 : index
    %c0_15 = arith.constant 0 : index
    %c0_16 = arith.constant 0 : index
    %29 = vector.load %arg5[%c0_14, %c0_15, %c0_16] : memref<2x128x32xf32, #tpu.memory_space<vmem>>, vector<1x128x32xf32>
    %30 = vector.shape_cast %29 : vector<1x128x32xf32> to vector<128x32xf32>
    %c10 = arith.constant 10 : index
    %c0_17 = arith.constant 0 : index
    %31 = vector.load %arg2[%c10, %c0_17] : memref<24x32xf32, #tpu.memory_space<vmem>>, vector<1x32xf32>
    %cst_18 = arith.constant dense<0.000000e+00> : vector<16x128xf32>
    %32 = tpu.matmul %25, %27, %cst_18 {dimension_numbers = #tpu.dot_dimension_numbers<[1], [0], [0], [1], [0, 0, 1, 1], [], []>} : vector<16x32xf32>, vector<32x128xf32>, vector<16x128xf32> -> vector<16x128xf32>
    %33 = vector.broadcast %28 : vector<1x128xf32> to vector<16x128xf32>
    %34 = arith.addf %32, %33 : vector<16x128xf32>
    %cst_19 = arith.constant 0.000000e+00 : f32
    %35 = vector.broadcast %cst_19 : f32 to vector<16x128xf32>
    %36 = arith.maximumf %34, %35 : vector<16x128xf32>
    %cst_20 = arith.constant dense<0.000000e+00> : vector<16x32xf32>
    %37 = tpu.matmul %36, %30, %cst_20 {dimension_numbers = #tpu.dot_dimension_numbers<[1], [0], [0], [1], [0, 0, 1, 1], [], []>} : vector<16x128xf32>, vector<128x32xf32>, vector<16x32xf32> -> vector<16x32xf32>
    %38 = vector.broadcast %31 : vector<1x32xf32> to vector<16x32xf32>
    %39 = arith.addf %37, %38 : vector<16x32xf32>
    %cst_21 = arith.constant 5.000000e-01 : f32
    %40 = vector.broadcast %cst_21 : f32 to vector<16x32xf32>
    %41 = arith.mulf %40, %39 : vector<16x32xf32>
    %42 = arith.addf %1, %41 : vector<16x32xf32>
    %cst_22 = arith.constant dense<0.000000e+00> : vector<16xf32>
    %43 = vector.multi_reduction <add>, %42, %cst_22 [1] : vector<16x32xf32> to vector<16xf32>
    %44 = vector.shape_cast %43 : vector<16xf32> to vector<16x1xf32>
    %cst_23 = arith.constant 3.200000e+01 : f32
    %45 = vector.broadcast %cst_23 : f32 to vector<16x1xf32>
    %46 = arith.divf %44, %45 : vector<16x1xf32>
    %47 = vector.broadcast %46 : vector<16x1xf32> to vector<16x32xf32>
    %48 = arith.subf %42, %47 : vector<16x32xf32>
    %49 = arith.mulf %48, %48 : vector<16x32xf32>
    %cst_24 = arith.constant dense<0.000000e+00> : vector<16xf32>
    %50 = vector.multi_reduction <add>, %49, %cst_24 [1] : vector<16x32xf32> to vector<16xf32>
    %51 = vector.shape_cast %50 : vector<16xf32> to vector<16x1xf32>
    %cst_25 = arith.constant 3.200000e+01 : f32
    %52 = vector.broadcast %cst_25 : f32 to vector<16x1xf32>
    %53 = arith.divf %51, %52 : vector<16x1xf32>
    %54 = vector.broadcast %46 : vector<16x1xf32> to vector<16x32xf32>
    %55 = arith.subf %42, %54 : vector<16x32xf32>
    %cst_26 = arith.constant 9.99999974E-6 : f32
    %56 = vector.broadcast %cst_26 : f32 to vector<16x1xf32>
    %57 = arith.addf %53, %56 : vector<16x1xf32>
    %58 = math.rsqrt %57 : vector<16x1xf32>
    %59 = vector.broadcast %58 : vector<16x1xf32> to vector<16x32xf32>
    %60 = arith.mulf %55, %59 : vector<16x32xf32>
    %c2 = arith.constant 2 : index
    %c0_27 = arith.constant 0 : index
    %61 = vector.load %arg2[%c2, %c0_27] : memref<24x32xf32, #tpu.memory_space<vmem>>, vector<1x32xf32>
    %62 = vector.broadcast %61 : vector<1x32xf32> to vector<16x32xf32>
    %63 = arith.mulf %60, %62 : vector<16x32xf32>
    %c3 = arith.constant 3 : index
    %c0_28 = arith.constant 0 : index
    %64 = vector.load %arg2[%c3, %c0_28] : memref<24x32xf32, #tpu.memory_space<vmem>>, vector<1x32xf32>
    %65 = vector.broadcast %64 : vector<1x32xf32> to vector<16x32xf32>
    %66 = arith.addf %63, %65 : vector<16x32xf32>
    %c0_29 = arith.constant 0 : index
    %c0_30 = arith.constant 0 : index
    %67 = vector.load %arg6[%c0_29, %c0_30] : memref<32x96xf32, #tpu.memory_space<vmem>>, vector<32x96xf32>
    %cst_31 = arith.constant dense<0.000000e+00> : vector<16x96xf32>
    %68 = tpu.matmul %66, %67, %cst_31 {dimension_numbers = #tpu.dot_dimension_numbers<[1], [0], [0], [1], [0, 0, 1, 1], [], []>} : vector<16x32xf32>, vector<32x96xf32>, vector<16x96xf32> -> vector<16x96xf32>
    %c3_32 = arith.constant 3 : index
    %c0_33 = arith.constant 0 : index
    %69 = vector.load %arg3[%c3_32, %c0_33] : memref<4x128xf32, #tpu.memory_space<vmem>>, vector<1x96xf32>
    %70 = vector.broadcast %69 : vector<1x96xf32> to vector<16x96xf32>
    %71 = arith.addf %68, %70 : vector<16x96xf32>
    %c0_34 = arith.constant 0 : index
    %c0_35 = arith.constant 0 : index
    %c0_36 = arith.constant 0 : index
    %72 = vector.load %arg8[%c0_34, %c0_35, %c0_36] : memref<2x32x32xf32, #tpu.memory_space<vmem>>, vector<1x32x32xf32>
    %73 = vector.shape_cast %72 : vector<1x32x32xf32> to vector<32x32xf32>
    %cst_37 = arith.constant 0.000000e+00 : f32
    %74 = vector.broadcast %cst_37 : f32 to vector<16x32xf32>
    %75 = vector.extract_strided_slice %71 {offsets = [0, 0], sizes = [16, 8], strides = [1, 1]} : vector<16x96xf32> to vector<16x8xf32>
    %76 = vector.shape_cast %75 : vector<16x8xf32> to vector<2x8x8xf32>
    %77 = vector.extract_strided_slice %71 {offsets = [0, 32], sizes = [16, 8], strides = [1, 1]} : vector<16x96xf32> to vector<16x8xf32>
    %78 = vector.shape_cast %77 : vector<16x8xf32> to vector<2x8x8xf32>
    %79 = vector.extract_strided_slice %71 {offsets = [0, 64], sizes = [16, 8], strides = [1, 1]} : vector<16x96xf32> to vector<16x8xf32>
    %80 = vector.shape_cast %79 : vector<16x8xf32> to vector<2x8x8xf32>
    "tpu.trace_start"() <{level = 10 : i32, message = "bqd,bkd->bqk"}> : () -> ()
    %cst_38 = arith.constant dense<0.000000e+00> : vector<2x8x8xf32>
    %81 = tpu.matmul %76, %78, %cst_38 {dimension_numbers = #tpu.dot_dimension_numbers<[2], [2], [1], [1], [0, 0, 0, 1, 1, 1], [0], [0]>} : vector<2x8x8xf32>, vector<2x8x8xf32>, vector<2x8x8xf32> -> vector<2x8x8xf32>
    "tpu.trace_stop"() : () -> ()
    %cst_39 = arith.constant 0.353553385 : f32
    %82 = vector.broadcast %cst_39 : f32 to vector<2x8x8xf32>
    %83 = arith.mulf %81, %82 : vector<2x8x8xf32>
    %cst_40 = arith.constant dense<0xFF800000> : vector<2x8xf32>
    %84 = vector.multi_reduction <maximumf>, %83, %cst_40 [2] : vector<2x8x8xf32> to vector<2x8xf32>
    %85 = vector.shape_cast %84 : vector<2x8xf32> to vector<2x8x1xf32>
    %86 = vector.broadcast %85 : vector<2x8x1xf32> to vector<2x8x8xf32>
    %87 = arith.subf %83, %86 : vector<2x8x8xf32>
    %88 = math.exp %87 : vector<2x8x8xf32>
    %cst_41 = arith.constant dense<0.000000e+00> : vector<2x8xf32>
    %89 = vector.multi_reduction <add>, %88, %cst_41 [2] : vector<2x8x8xf32> to vector<2x8xf32>
    %90 = vector.shape_cast %89 : vector<2x8xf32> to vector<2x8x1xf32>
    %91 = tpu.reciprocal %90 {approx = true} : vector<2x8x1xf32> -> vector<2x8x1xf32>
    %92 = vector.broadcast %91 : vector<2x8x1xf32> to vector<2x8x8xf32>
    %93 = arith.mulf %88, %92 : vector<2x8x8xf32>
    "tpu.trace_start"() <{level = 10 : i32, message = "bqk,bkd->bqd"}> : () -> ()
    %cst_42 = arith.constant dense<0.000000e+00> : vector<2x8x8xf32>
    %94 = tpu.matmul %93, %80, %cst_42 {dimension_numbers = #tpu.dot_dimension_numbers<[2], [1], [1], [2], [0, 0, 0, 1, 1, 2], [0], [0]>} : vector<2x8x8xf32>, vector<2x8x8xf32>, vector<2x8x8xf32> -> vector<2x8x8xf32>
    "tpu.trace_stop"() : () -> ()
    %95 = vector.shape_cast %94 : vector<2x8x8xf32> to vector<16x8xf32>
    %96 = vector.extract_strided_slice %73 {offsets = [0, 0], sizes = [8, 32], strides = [1, 1]} : vector<32x32xf32> to vector<8x32xf32>
    %cst_43 = arith.constant dense<0.000000e+00> : vector<16x32xf32>
    %97 = tpu.matmul %95, %96, %cst_43 {dimension_numbers = #tpu.dot_dimension_numbers<[1], [0], [0], [1], [0, 0, 1, 1], [], []>} : vector<16x8xf32>, vector<8x32xf32>, vector<16x32xf32> -> vector<16x32xf32>
    %98 = arith.addf %74, %97 : vector<16x32xf32>
    %99 = vector.extract_strided_slice %71 {offsets = [0, 8], sizes = [16, 8], strides = [1, 1]} : vector<16x96xf32> to vector<16x8xf32>
    %100 = vector.shape_cast %99 : vector<16x8xf32> to vector<2x8x8xf32>
    %101 = vector.extract_strided_slice %71 {offsets = [0, 40], sizes = [16, 8], strides = [1, 1]} : vector<16x96xf32> to vector<16x8xf32>
    %102 = vector.shape_cast %101 : vector<16x8xf32> to vector<2x8x8xf32>
    %103 = vector.extract_strided_slice %71 {offsets = [0, 72], sizes = [16, 8], strides = [1, 1]} : vector<16x96xf32> to vector<16x8xf32>
    %104 = vector.shape_cast %103 : vector<16x8xf32> to vector<2x8x8xf32>
    "tpu.trace_start"() <{level = 10 : i32, message = "bqd,bkd->bqk"}> : () -> ()
    %cst_44 = arith.constant dense<0.000000e+00> : vector<2x8x8xf32>
    %105 = tpu.matmul %100, %102, %cst_44 {dimension_numbers = #tpu.dot_dimension_numbers<[2], [2], [1], [1], [0, 0, 0, 1, 1, 1], [0], [0]>} : vector<2x8x8xf32>, vector<2x8x8xf32>, vector<2x8x8xf32> -> vector<2x8x8xf32>
    "tpu.trace_stop"() : () -> ()
    %cst_45 = arith.constant 0.353553385 : f32
    %106 = vector.broadcast %cst_45 : f32 to vector<2x8x8xf32>
    %107 = arith.mulf %105, %106 : vector<2x8x8xf32>
    %cst_46 = arith.constant dense<0xFF800000> : vector<2x8xf32>
    %108 = vector.multi_reduction <maximumf>, %107, %cst_46 [2] : vector<2x8x8xf32> to vector<2x8xf32>
    %109 = vector.shape_cast %108 : vector<2x8xf32> to vector<2x8x1xf32>
    %110 = vector.broadcast %109 : vector<2x8x1xf32> to vector<2x8x8xf32>
    %111 = arith.subf %107, %110 : vector<2x8x8xf32>
    %112 = math.exp %111 : vector<2x8x8xf32>
    %cst_47 = arith.constant dense<0.000000e+00> : vector<2x8xf32>
    %113 = vector.multi_reduction <add>, %112, %cst_47 [2] : vector<2x8x8xf32> to vector<2x8xf32>
    %114 = vector.shape_cast %113 : vector<2x8xf32> to vector<2x8x1xf32>
    %115 = tpu.reciprocal %114 {approx = true} : vector<2x8x1xf32> -> vector<2x8x1xf32>
    %116 = vector.broadcast %115 : vector<2x8x1xf32> to vector<2x8x8xf32>
    %117 = arith.mulf %112, %116 : vector<2x8x8xf32>
    "tpu.trace_start"() <{level = 10 : i32, message = "bqk,bkd->bqd"}> : () -> ()
    %cst_48 = arith.constant dense<0.000000e+00> : vector<2x8x8xf32>
    %118 = tpu.matmul %117, %104, %cst_48 {dimension_numbers = #tpu.dot_dimension_numbers<[2], [1], [1], [2], [0, 0, 0, 1, 1, 2], [0], [0]>} : vector<2x8x8xf32>, vector<2x8x8xf32>, vector<2x8x8xf32> -> vector<2x8x8xf32>
    "tpu.trace_stop"() : () -> ()
    %119 = vector.shape_cast %118 : vector<2x8x8xf32> to vector<16x8xf32>
    %120 = vector.extract_strided_slice %73 {offsets = [8, 0], sizes = [8, 32], strides = [1, 1]} : vector<32x32xf32> to vector<8x32xf32>
    %cst_49 = arith.constant dense<0.000000e+00> : vector<16x32xf32>
    %121 = tpu.matmul %119, %120, %cst_49 {dimension_numbers = #tpu.dot_dimension_numbers<[1], [0], [0], [1], [0, 0, 1, 1], [], []>} : vector<16x8xf32>, vector<8x32xf32>, vector<16x32xf32> -> vector<16x32xf32>
    %122 = arith.addf %98, %121 : vector<16x32xf32>
    %123 = vector.extract_strided_slice %71 {offsets = [0, 16], sizes = [16, 8], strides = [1, 1]} : vector<16x96xf32> to vector<16x8xf32>
    %124 = vector.shape_cast %123 : vector<16x8xf32> to vector<2x8x8xf32>
    %125 = vector.extract_strided_slice %71 {offsets = [0, 48], sizes = [16, 8], strides = [1, 1]} : vector<16x96xf32> to vector<16x8xf32>
    %126 = vector.shape_cast %125 : vector<16x8xf32> to vector<2x8x8xf32>
    %127 = vector.extract_strided_slice %71 {offsets = [0, 80], sizes = [16, 8], strides = [1, 1]} : vector<16x96xf32> to vector<16x8xf32>
    %128 = vector.shape_cast %127 : vector<16x8xf32> to vector<2x8x8xf32>
    "tpu.trace_start"() <{level = 10 : i32, message = "bqd,bkd->bqk"}> : () -> ()
    %cst_50 = arith.constant dense<0.000000e+00> : vector<2x8x8xf32>
    %129 = tpu.matmul %124, %126, %cst_50 {dimension_numbers = #tpu.dot_dimension_numbers<[2], [2], [1], [1], [0, 0, 0, 1, 1, 1], [0], [0]>} : vector<2x8x8xf32>, vector<2x8x8xf32>, vector<2x8x8xf32> -> vector<2x8x8xf32>
    "tpu.trace_stop"() : () -> ()
    %cst_51 = arith.constant 0.353553385 : f32
    %130 = vector.broadcast %cst_51 : f32 to vector<2x8x8xf32>
    %131 = arith.mulf %129, %130 : vector<2x8x8xf32>
    %cst_52 = arith.constant dense<0xFF800000> : vector<2x8xf32>
    %132 = vector.multi_reduction <maximumf>, %131, %cst_52 [2] : vector<2x8x8xf32> to vector<2x8xf32>
    %133 = vector.shape_cast %132 : vector<2x8xf32> to vector<2x8x1xf32>
    %134 = vector.broadcast %133 : vector<2x8x1xf32> to vector<2x8x8xf32>
    %135 = arith.subf %131, %134 : vector<2x8x8xf32>
    %136 = math.exp %135 : vector<2x8x8xf32>
    %cst_53 = arith.constant dense<0.000000e+00> : vector<2x8xf32>
    %137 = vector.multi_reduction <add>, %136, %cst_53 [2] : vector<2x8x8xf32> to vector<2x8xf32>
    %138 = vector.shape_cast %137 : vector<2x8xf32> to vector<2x8x1xf32>
    %139 = tpu.reciprocal %138 {approx = true} : vector<2x8x1xf32> -> vector<2x8x1xf32>
    %140 = vector.broadcast %139 : vector<2x8x1xf32> to vector<2x8x8xf32>
    %141 = arith.mulf %136, %140 : vector<2x8x8xf32>
    "tpu.trace_start"() <{level = 10 : i32, message = "bqk,bkd->bqd"}> : () -> ()
    %cst_54 = arith.constant dense<0.000000e+00> : vector<2x8x8xf32>
    %142 = tpu.matmul %141, %128, %cst_54 {dimension_numbers = #tpu.dot_dimension_numbers<[2], [1], [1], [2], [0, 0, 0, 1, 1, 2], [0], [0]>} : vector<2x8x8xf32>, vector<2x8x8xf32>, vector<2x8x8xf32> -> vector<2x8x8xf32>
    "tpu.trace_stop"() : () -> ()
    %143 = vector.shape_cast %142 : vector<2x8x8xf32> to vector<16x8xf32>
    %144 = vector.extract_strided_slice %73 {offsets = [16, 0], sizes = [8, 32], strides = [1, 1]} : vector<32x32xf32> to vector<8x32xf32>
    %cst_55 = arith.constant dense<0.000000e+00> : vector<16x32xf32>
    %145 = tpu.matmul %143, %144, %cst_55 {dimension_numbers = #tpu.dot_dimension_numbers<[1], [0], [0], [1], [0, 0, 1, 1], [], []>} : vector<16x8xf32>, vector<8x32xf32>, vector<16x32xf32> -> vector<16x32xf32>
    %146 = arith.addf %122, %145 : vector<16x32xf32>
    %147 = vector.extract_strided_slice %71 {offsets = [0, 24], sizes = [16, 8], strides = [1, 1]} : vector<16x96xf32> to vector<16x8xf32>
    %148 = vector.shape_cast %147 : vector<16x8xf32> to vector<2x8x8xf32>
    %149 = vector.extract_strided_slice %71 {offsets = [0, 56], sizes = [16, 8], strides = [1, 1]} : vector<16x96xf32> to vector<16x8xf32>
    %150 = vector.shape_cast %149 : vector<16x8xf32> to vector<2x8x8xf32>
    %151 = vector.extract_strided_slice %71 {offsets = [0, 88], sizes = [16, 8], strides = [1, 1]} : vector<16x96xf32> to vector<16x8xf32>
    %152 = vector.shape_cast %151 : vector<16x8xf32> to vector<2x8x8xf32>
    "tpu.trace_start"() <{level = 10 : i32, message = "bqd,bkd->bqk"}> : () -> ()
    %cst_56 = arith.constant dense<0.000000e+00> : vector<2x8x8xf32>
    %153 = tpu.matmul %148, %150, %cst_56 {dimension_numbers = #tpu.dot_dimension_numbers<[2], [2], [1], [1], [0, 0, 0, 1, 1, 1], [0], [0]>} : vector<2x8x8xf32>, vector<2x8x8xf32>, vector<2x8x8xf32> -> vector<2x8x8xf32>
    "tpu.trace_stop"() : () -> ()
    %cst_57 = arith.constant 0.353553385 : f32
    %154 = vector.broadcast %cst_57 : f32 to vector<2x8x8xf32>
    %155 = arith.mulf %153, %154 : vector<2x8x8xf32>
    %cst_58 = arith.constant dense<0xFF800000> : vector<2x8xf32>
    %156 = vector.multi_reduction <maximumf>, %155, %cst_58 [2] : vector<2x8x8xf32> to vector<2x8xf32>
    %157 = vector.shape_cast %156 : vector<2x8xf32> to vector<2x8x1xf32>
    %158 = vector.broadcast %157 : vector<2x8x1xf32> to vector<2x8x8xf32>
    %159 = arith.subf %155, %158 : vector<2x8x8xf32>
    %160 = math.exp %159 : vector<2x8x8xf32>
    %cst_59 = arith.constant dense<0.000000e+00> : vector<2x8xf32>
    %161 = vector.multi_reduction <add>, %160, %cst_59 [2] : vector<2x8x8xf32> to vector<2x8xf32>
    %162 = vector.shape_cast %161 : vector<2x8xf32> to vector<2x8x1xf32>
    %163 = tpu.reciprocal %162 {approx = true} : vector<2x8x1xf32> -> vector<2x8x1xf32>
    %164 = vector.broadcast %163 : vector<2x8x1xf32> to vector<2x8x8xf32>
    %165 = arith.mulf %160, %164 : vector<2x8x8xf32>
    "tpu.trace_start"() <{level = 10 : i32, message = "bqk,bkd->bqd"}> : () -> ()
    %cst_60 = arith.constant dense<0.000000e+00> : vector<2x8x8xf32>
    %166 = tpu.matmul %165, %152, %cst_60 {dimension_numbers = #tpu.dot_dimension_numbers<[2], [1], [1], [2], [0, 0, 0, 1, 1, 2], [0], [0]>} : vector<2x8x8xf32>, vector<2x8x8xf32>, vector<2x8x8xf32> -> vector<2x8x8xf32>
    "tpu.trace_stop"() : () -> ()
    %167 = vector.shape_cast %166 : vector<2x8x8xf32> to vector<16x8xf32>
    %168 = vector.extract_strided_slice %73 {offsets = [24, 0], sizes = [8, 32], strides = [1, 1]} : vector<32x32xf32> to vector<8x32xf32>
    %cst_61 = arith.constant dense<0.000000e+00> : vector<16x32xf32>
    %169 = tpu.matmul %167, %168, %cst_61 {dimension_numbers = #tpu.dot_dimension_numbers<[1], [0], [0], [1], [0, 0, 1, 1], [], []>} : vector<16x8xf32>, vector<8x32xf32>, vector<16x32xf32> -> vector<16x32xf32>
    %170 = arith.addf %146, %169 : vector<16x32xf32>
    %171 = arith.addf %42, %170 : vector<16x32xf32>
    %c11 = arith.constant 11 : index
    %c0_62 = arith.constant 0 : index
    %172 = vector.load %arg2[%c11, %c0_62] : memref<24x32xf32, #tpu.memory_space<vmem>>, vector<1x32xf32>
    %173 = vector.broadcast %172 : vector<1x32xf32> to vector<16x32xf32>
    %174 = arith.addf %171, %173 : vector<16x32xf32>
    %cst_63 = arith.constant dense<0.000000e+00> : vector<16xf32>
    %175 = vector.multi_reduction <add>, %174, %cst_63 [1] : vector<16x32xf32> to vector<16xf32>
    %176 = vector.shape_cast %175 : vector<16xf32> to vector<16x1xf32>
    %cst_64 = arith.constant 3.200000e+01 : f32
    %177 = vector.broadcast %cst_64 : f32 to vector<16x1xf32>
    %178 = arith.divf %176, %177 : vector<16x1xf32>
    %179 = vector.broadcast %178 : vector<16x1xf32> to vector<16x32xf32>
    %180 = arith.subf %174, %179 : vector<16x32xf32>
    %181 = arith.mulf %180, %180 : vector<16x32xf32>
    %cst_65 = arith.constant dense<0.000000e+00> : vector<16xf32>
    %182 = vector.multi_reduction <add>, %181, %cst_65 [1] : vector<16x32xf32> to vector<16xf32>
    %183 = vector.shape_cast %182 : vector<16xf32> to vector<16x1xf32>
    %cst_66 = arith.constant 3.200000e+01 : f32
    %184 = vector.broadcast %cst_66 : f32 to vector<16x1xf32>
    %185 = arith.divf %183, %184 : vector<16x1xf32>
    %186 = vector.broadcast %178 : vector<16x1xf32> to vector<16x32xf32>
    %187 = arith.subf %174, %186 : vector<16x32xf32>
    %cst_67 = arith.constant 9.99999974E-6 : f32
    %188 = vector.broadcast %cst_67 : f32 to vector<16x1xf32>
    %189 = arith.addf %185, %188 : vector<16x1xf32>
    %190 = math.rsqrt %189 : vector<16x1xf32>
    %191 = vector.broadcast %190 : vector<16x1xf32> to vector<16x32xf32>
    %192 = arith.mulf %187, %191 : vector<16x32xf32>
    %c4 = arith.constant 4 : index
    %c0_68 = arith.constant 0 : index
    %193 = vector.load %arg2[%c4, %c0_68] : memref<24x32xf32, #tpu.memory_space<vmem>>, vector<1x32xf32>
    %194 = vector.broadcast %193 : vector<1x32xf32> to vector<16x32xf32>
    %195 = arith.mulf %192, %194 : vector<16x32xf32>
    %c5 = arith.constant 5 : index
    %c0_69 = arith.constant 0 : index
    %196 = vector.load %arg2[%c5, %c0_69] : memref<24x32xf32, #tpu.memory_space<vmem>>, vector<1x32xf32>
    %197 = vector.broadcast %196 : vector<1x32xf32> to vector<16x32xf32>
    %198 = arith.addf %195, %197 : vector<16x32xf32>
    %c0_70 = arith.constant 0 : index
    %c0_71 = arith.constant 0 : index
    %199 = vector.load %arg7[%c0_70, %c0_71] : memref<32x64xf32, #tpu.memory_space<vmem>>, vector<32x64xf32>
    %cst_72 = arith.constant dense<0.000000e+00> : vector<16x64xf32>
    %200 = tpu.matmul %198, %199, %cst_72 {dimension_numbers = #tpu.dot_dimension_numbers<[1], [0], [0], [1], [0, 0, 1, 1], [], []>} : vector<16x32xf32>, vector<32x64xf32>, vector<16x64xf32> -> vector<16x64xf32>
    %c2_73 = arith.constant 2 : index
    %c0_74 = arith.constant 0 : index
    %201 = vector.load %arg3[%c2_73, %c0_74] : memref<4x128xf32, #tpu.memory_space<vmem>>, vector<1x64xf32>
    %202 = vector.broadcast %201 : vector<1x64xf32> to vector<16x64xf32>
    %203 = arith.addf %200, %202 : vector<16x64xf32>
    %204 = vector.extract_strided_slice %203 {offsets = [0, 0], sizes = [16, 32], strides = [1, 1]} : vector<16x64xf32> to vector<16x32xf32>
    %205 = vector.extract_strided_slice %203 {offsets = [0, 32], sizes = [16, 32], strides = [1, 1]} : vector<16x64xf32> to vector<16x32xf32>
    %206 = arith.negf %205 : vector<16x32xf32>
    %207 = math.exp %206 : vector<16x32xf32>
    %cst_75 = arith.constant 1.000000e+00 : f32
    %208 = vector.broadcast %cst_75 : f32 to vector<16x32xf32>
    %209 = arith.addf %208, %207 : vector<16x32xf32>
    %210 = arith.divf %208, %209 : vector<16x32xf32>
    %211 = arith.mulf %204, %210 : vector<16x32xf32>
    %212 = tpu.iota {dimensions = array<i32: 0>} : vector<16x32xi32>
    %c8_i32 = arith.constant 8 : i32
    %c0_i32 = arith.constant 0 : i32
    %213 = arith.cmpi eq, %c8_i32, %c0_i32 : i32
    %c1_i32 = arith.constant 1 : i32
    %214 = arith.select %213, %c1_i32, %c8_i32 : i32
    %215 = vector.broadcast %214 : i32 to vector<16x32xi32>
    %216 = arith.remsi %212, %215 : vector<16x32xi32>
    %c0_i32_76 = arith.constant 0 : i32
    %217 = vector.broadcast %c0_i32_76 : i32 to vector<16x32xi32>
    %218 = arith.cmpi ne, %216, %217 : vector<16x32xi32>
    %c0_i32_77 = arith.constant 0 : i32
    %219 = vector.broadcast %c0_i32_77 : i32 to vector<16x32xi32>
    %220 = arith.cmpi slt, %216, %219 : vector<16x32xi32>
    %c0_i32_78 = arith.constant 0 : i32
    %221 = arith.cmpi slt, %214, %c0_i32_78 : i32
    %222 = vector.broadcast %221 : i1 to vector<16x32xi1>
    %223 = vector.broadcast %222 : vector<16x32xi1> to vector<16x32xi1>
    %224 = arith.xori %220, %223 : vector<16x32xi1>
    %225 = arith.andi %224, %218 : vector<16x32xi1>
    %226 = vector.broadcast %214 : i32 to vector<16x32xi32>
    %227 = arith.addi %216, %226 : vector<16x32xi32>
    %228 = arith.select %225, %227, %216 : vector<16x32xi1>, vector<16x32xi32>
    %cst_79 = arith.constant 0.000000e+00 : f32
    %229 = vector.broadcast %cst_79 : f32 to vector<16x32xf32>
    %c3_i32 = arith.constant 3 : i32
    %230 = tpu.dynamic_rotate %211 by %c3_i32 dim 0 : vector<16x32xf32>, i32 -> vector<16x32xf32>
    %c-3_i32 = arith.constant -3 : i32
    %231 = vector.broadcast %c-3_i32 : i32 to vector<16x32xi32>
    %232 = arith.addi %228, %231 : vector<16x32xi32>
    %c0_i32_80 = arith.constant 0 : i32
    %233 = vector.broadcast %c0_i32_80 : i32 to vector<16x32xi32>
    %234 = arith.cmpi sge, %232, %233 : vector<16x32xi32>
    %c-3_i32_81 = arith.constant -3 : i32
    %235 = vector.broadcast %c-3_i32_81 : i32 to vector<16x32xi32>
    %236 = arith.addi %228, %235 : vector<16x32xi32>
    %c8_i32_82 = arith.constant 8 : i32
    %237 = vector.broadcast %c8_i32_82 : i32 to vector<16x32xi32>
    %238 = arith.cmpi slt, %236, %237 : vector<16x32xi32>
    %239 = arith.andi %234, %238 : vector<16x32xi1>
    %cst_83 = arith.constant 0.000000e+00 : f32
    %240 = vector.broadcast %cst_83 : f32 to vector<16x32xf32>
    %241 = arith.select %239, %230, %240 : vector<16x32xi1>, vector<16x32xf32>
    %c17 = arith.constant 17 : index
    %c0_84 = arith.constant 0 : index
    %242 = vector.load %arg2[%c17, %c0_84] : memref<24x32xf32, #tpu.memory_space<vmem>>, vector<1x32xf32>
    %243 = vector.broadcast %242 : vector<1x32xf32> to vector<16x32xf32>
    %244 = arith.mulf %241, %243 : vector<16x32xf32>
    %245 = arith.addf %229, %244 : vector<16x32xf32>
    %c2_i32 = arith.constant 2 : i32
    %246 = tpu.dynamic_rotate %211 by %c2_i32 dim 0 : vector<16x32xf32>, i32 -> vector<16x32xf32>
    %c-2_i32 = arith.constant -2 : i32
    %247 = vector.broadcast %c-2_i32 : i32 to vector<16x32xi32>
    %248 = arith.addi %228, %247 : vector<16x32xi32>
    %c0_i32_85 = arith.constant 0 : i32
    %249 = vector.broadcast %c0_i32_85 : i32 to vector<16x32xi32>
    %250 = arith.cmpi sge, %248, %249 : vector<16x32xi32>
    %c-2_i32_86 = arith.constant -2 : i32
    %251 = vector.broadcast %c-2_i32_86 : i32 to vector<16x32xi32>
    %252 = arith.addi %228, %251 : vector<16x32xi32>
    %c8_i32_87 = arith.constant 8 : i32
    %253 = vector.broadcast %c8_i32_87 : i32 to vector<16x32xi32>
    %254 = arith.cmpi slt, %252, %253 : vector<16x32xi32>
    %255 = arith.andi %250, %254 : vector<16x32xi1>
    %cst_88 = arith.constant 0.000000e+00 : f32
    %256 = vector.broadcast %cst_88 : f32 to vector<16x32xf32>
    %257 = arith.select %255, %246, %256 : vector<16x32xi1>, vector<16x32xf32>
    %c18 = arith.constant 18 : index
    %c0_89 = arith.constant 0 : index
    %258 = vector.load %arg2[%c18, %c0_89] : memref<24x32xf32, #tpu.memory_space<vmem>>, vector<1x32xf32>
    %259 = vector.broadcast %258 : vector<1x32xf32> to vector<16x32xf32>
    %260 = arith.mulf %257, %259 : vector<16x32xf32>
    %261 = arith.addf %245, %260 : vector<16x32xf32>
    %c1_i32_90 = arith.constant 1 : i32
    %262 = tpu.dynamic_rotate %211 by %c1_i32_90 dim 0 : vector<16x32xf32>, i32 -> vector<16x32xf32>
    %c-1_i32 = arith.constant -1 : i32
    %263 = vector.broadcast %c-1_i32 : i32 to vector<16x32xi32>
    %264 = arith.addi %228, %263 : vector<16x32xi32>
    %c0_i32_91 = arith.constant 0 : i32
    %265 = vector.broadcast %c0_i32_91 : i32 to vector<16x32xi32>
    %266 = arith.cmpi sge, %264, %265 : vector<16x32xi32>
    %c-1_i32_92 = arith.constant -1 : i32
    %267 = vector.broadcast %c-1_i32_92 : i32 to vector<16x32xi32>
    %268 = arith.addi %228, %267 : vector<16x32xi32>
    %c8_i32_93 = arith.constant 8 : i32
    %269 = vector.broadcast %c8_i32_93 : i32 to vector<16x32xi32>
    %270 = arith.cmpi slt, %268, %269 : vector<16x32xi32>
    %271 = arith.andi %266, %270 : vector<16x32xi1>
    %cst_94 = arith.constant 0.000000e+00 : f32
    %272 = vector.broadcast %cst_94 : f32 to vector<16x32xf32>
    %273 = arith.select %271, %262, %272 : vector<16x32xi1>, vector<16x32xf32>
    %c19 = arith.constant 19 : index
    %c0_95 = arith.constant 0 : index
    %274 = vector.load %arg2[%c19, %c0_95] : memref<24x32xf32, #tpu.memory_space<vmem>>, vector<1x32xf32>
    %275 = vector.broadcast %274 : vector<1x32xf32> to vector<16x32xf32>
    %276 = arith.mulf %273, %275 : vector<16x32xf32>
    %277 = arith.addf %261, %276 : vector<16x32xf32>
    %c0_i32_96 = arith.constant 0 : i32
    %278 = vector.broadcast %c0_i32_96 : i32 to vector<16x32xi32>
    %279 = arith.addi %228, %278 : vector<16x32xi32>
    %c0_i32_97 = arith.constant 0 : i32
    %280 = vector.broadcast %c0_i32_97 : i32 to vector<16x32xi32>
    %281 = arith.cmpi sge, %279, %280 : vector<16x32xi32>
    %c0_i32_98 = arith.constant 0 : i32
    %282 = vector.broadcast %c0_i32_98 : i32 to vector<16x32xi32>
    %283 = arith.addi %228, %282 : vector<16x32xi32>
    %c8_i32_99 = arith.constant 8 : i32
    %284 = vector.broadcast %c8_i32_99 : i32 to vector<16x32xi32>
    %285 = arith.cmpi slt, %283, %284 : vector<16x32xi32>
    %286 = arith.andi %281, %285 : vector<16x32xi1>
    %cst_100 = arith.constant 0.000000e+00 : f32
    %287 = vector.broadcast %cst_100 : f32 to vector<16x32xf32>
    %288 = arith.select %286, %211, %287 : vector<16x32xi1>, vector<16x32xf32>
    %c20 = arith.constant 20 : index
    %c0_101 = arith.constant 0 : index
    %289 = vector.load %arg2[%c20, %c0_101] : memref<24x32xf32, #tpu.memory_space<vmem>>, vector<1x32xf32>
    %290 = vector.broadcast %289 : vector<1x32xf32> to vector<16x32xf32>
    %291 = arith.mulf %288, %290 : vector<16x32xf32>
    %292 = arith.addf %277, %291 : vector<16x32xf32>
    %c15_i32 = arith.constant 15 : i32
    %293 = tpu.dynamic_rotate %211 by %c15_i32 dim 0 : vector<16x32xf32>, i32 -> vector<16x32xf32>
    %c1_i32_102 = arith.constant 1 : i32
    %294 = vector.broadcast %c1_i32_102 : i32 to vector<16x32xi32>
    %295 = arith.addi %228, %294 : vector<16x32xi32>
    %c0_i32_103 = arith.constant 0 : i32
    %296 = vector.broadcast %c0_i32_103 : i32 to vector<16x32xi32>
    %297 = arith.cmpi sge, %295, %296 : vector<16x32xi32>
    %c1_i32_104 = arith.constant 1 : i32
    %298 = vector.broadcast %c1_i32_104 : i32 to vector<16x32xi32>
    %299 = arith.addi %228, %298 : vector<16x32xi32>
    %c8_i32_105 = arith.constant 8 : i32
    %300 = vector.broadcast %c8_i32_105 : i32 to vector<16x32xi32>
    %301 = arith.cmpi slt, %299, %300 : vector<16x32xi32>
    %302 = arith.andi %297, %301 : vector<16x32xi1>
    %cst_106 = arith.constant 0.000000e+00 : f32
    %303 = vector.broadcast %cst_106 : f32 to vector<16x32xf32>
    %304 = arith.select %302, %293, %303 : vector<16x32xi1>, vector<16x32xf32>
    %c21 = arith.constant 21 : index
    %c0_107 = arith.constant 0 : index
    %305 = vector.load %arg2[%c21, %c0_107] : memref<24x32xf32, #tpu.memory_space<vmem>>, vector<1x32xf32>
    %306 = vector.broadcast %305 : vector<1x32xf32> to vector<16x32xf32>
    %307 = arith.mulf %304, %306 : vector<16x32xf32>
    %308 = arith.addf %292, %307 : vector<16x32xf32>
    %c14_i32 = arith.constant 14 : i32
    %309 = tpu.dynamic_rotate %211 by %c14_i32 dim 0 : vector<16x32xf32>, i32 -> vector<16x32xf32>
    %c2_i32_108 = arith.constant 2 : i32
    %310 = vector.broadcast %c2_i32_108 : i32 to vector<16x32xi32>
    %311 = arith.addi %228, %310 : vector<16x32xi32>
    %c0_i32_109 = arith.constant 0 : i32
    %312 = vector.broadcast %c0_i32_109 : i32 to vector<16x32xi32>
    %313 = arith.cmpi sge, %311, %312 : vector<16x32xi32>
    %c2_i32_110 = arith.constant 2 : i32
    %314 = vector.broadcast %c2_i32_110 : i32 to vector<16x32xi32>
    %315 = arith.addi %228, %314 : vector<16x32xi32>
    %c8_i32_111 = arith.constant 8 : i32
    %316 = vector.broadcast %c8_i32_111 : i32 to vector<16x32xi32>
    %317 = arith.cmpi slt, %315, %316 : vector<16x32xi32>
    %318 = arith.andi %313, %317 : vector<16x32xi1>
    %cst_112 = arith.constant 0.000000e+00 : f32
    %319 = vector.broadcast %cst_112 : f32 to vector<16x32xf32>
    %320 = arith.select %318, %309, %319 : vector<16x32xi1>, vector<16x32xf32>
    %c22 = arith.constant 22 : index
    %c0_113 = arith.constant 0 : index
    %321 = vector.load %arg2[%c22, %c0_113] : memref<24x32xf32, #tpu.memory_space<vmem>>, vector<1x32xf32>
    %322 = vector.broadcast %321 : vector<1x32xf32> to vector<16x32xf32>
    %323 = arith.mulf %320, %322 : vector<16x32xf32>
    %324 = arith.addf %308, %323 : vector<16x32xf32>
    %c13_i32 = arith.constant 13 : i32
    %325 = tpu.dynamic_rotate %211 by %c13_i32 dim 0 : vector<16x32xf32>, i32 -> vector<16x32xf32>
    %c3_i32_114 = arith.constant 3 : i32
    %326 = vector.broadcast %c3_i32_114 : i32 to vector<16x32xi32>
    %327 = arith.addi %228, %326 : vector<16x32xi32>
    %c0_i32_115 = arith.constant 0 : i32
    %328 = vector.broadcast %c0_i32_115 : i32 to vector<16x32xi32>
    %329 = arith.cmpi sge, %327, %328 : vector<16x32xi32>
    %c3_i32_116 = arith.constant 3 : i32
    %330 = vector.broadcast %c3_i32_116 : i32 to vector<16x32xi32>
    %331 = arith.addi %228, %330 : vector<16x32xi32>
    %c8_i32_117 = arith.constant 8 : i32
    %332 = vector.broadcast %c8_i32_117 : i32 to vector<16x32xi32>
    %333 = arith.cmpi slt, %331, %332 : vector<16x32xi32>
    %334 = arith.andi %329, %333 : vector<16x32xi1>
    %cst_118 = arith.constant 0.000000e+00 : f32
    %335 = vector.broadcast %cst_118 : f32 to vector<16x32xf32>
    %336 = arith.select %334, %325, %335 : vector<16x32xi1>, vector<16x32xf32>
    %c23 = arith.constant 23 : index
    %c0_119 = arith.constant 0 : index
    %337 = vector.load %arg2[%c23, %c0_119] : memref<24x32xf32, #tpu.memory_space<vmem>>, vector<1x32xf32>
    %338 = vector.broadcast %337 : vector<1x32xf32> to vector<16x32xf32>
    %339 = arith.mulf %336, %338 : vector<16x32xf32>
    %340 = arith.addf %324, %339 : vector<16x32xf32>
    %c12 = arith.constant 12 : index
    %c0_120 = arith.constant 0 : index
    %341 = vector.load %arg2[%c12, %c0_120] : memref<24x32xf32, #tpu.memory_space<vmem>>, vector<1x32xf32>
    %342 = vector.broadcast %341 : vector<1x32xf32> to vector<16x32xf32>
    %343 = arith.addf %340, %342 : vector<16x32xf32>
    %c13 = arith.constant 13 : index
    %c0_121 = arith.constant 0 : index
    %344 = vector.load %arg2[%c13, %c0_121] : memref<24x32xf32, #tpu.memory_space<vmem>>, vector<1x32xf32>
    %345 = vector.broadcast %344 : vector<1x32xf32> to vector<16x32xf32>
    %346 = arith.mulf %343, %345 : vector<16x32xf32>
    %c14 = arith.constant 14 : index
    %c0_122 = arith.constant 0 : index
    %347 = vector.load %arg2[%c14, %c0_122] : memref<24x32xf32, #tpu.memory_space<vmem>>, vector<1x32xf32>
    %348 = vector.broadcast %347 : vector<1x32xf32> to vector<16x32xf32>
    %349 = arith.addf %346, %348 : vector<16x32xf32>
    %cst_123 = arith.constant 0.000000e+00 : f32
    %350 = vector.broadcast %cst_123 : f32 to vector<16x32xf32>
    %351 = arith.maximumf %349, %350 : vector<16x32xf32>
    %c1_124 = arith.constant 1 : index
    %c0_125 = arith.constant 0 : index
    %c0_126 = arith.constant 0 : index
    %352 = vector.load %arg8[%c1_124, %c0_125, %c0_126] : memref<2x32x32xf32, #tpu.memory_space<vmem>>, vector<1x32x32xf32>
    %353 = vector.shape_cast %352 : vector<1x32x32xf32> to vector<32x32xf32>
    %cst_127 = arith.constant dense<0.000000e+00> : vector<16x32xf32>
    %354 = tpu.matmul %351, %353, %cst_127 {dimension_numbers = #tpu.dot_dimension_numbers<[1], [0], [0], [1], [0, 0, 1, 1], [], []>} : vector<16x32xf32>, vector<32x32xf32>, vector<16x32xf32> -> vector<16x32xf32>
    %c15 = arith.constant 15 : index
    %c0_128 = arith.constant 0 : index
    %355 = vector.load %arg2[%c15, %c0_128] : memref<24x32xf32, #tpu.memory_space<vmem>>, vector<1x32xf32>
    %356 = vector.broadcast %355 : vector<1x32xf32> to vector<16x32xf32>
    %357 = arith.addf %354, %356 : vector<16x32xf32>
    %358 = arith.addf %174, %357 : vector<16x32xf32>
    %cst_129 = arith.constant dense<0.000000e+00> : vector<16xf32>
    %359 = vector.multi_reduction <add>, %358, %cst_129 [1] : vector<16x32xf32> to vector<16xf32>
    %360 = vector.shape_cast %359 : vector<16xf32> to vector<16x1xf32>
    %cst_130 = arith.constant 3.200000e+01 : f32
    %361 = vector.broadcast %cst_130 : f32 to vector<16x1xf32>
    %362 = arith.divf %360, %361 : vector<16x1xf32>
    %363 = vector.broadcast %362 : vector<16x1xf32> to vector<16x32xf32>
    %364 = arith.subf %358, %363 : vector<16x32xf32>
    %365 = arith.mulf %364, %364 : vector<16x32xf32>
    %cst_131 = arith.constant dense<0.000000e+00> : vector<16xf32>
    %366 = vector.multi_reduction <add>, %365, %cst_131 [1] : vector<16x32xf32> to vector<16xf32>
    %367 = vector.shape_cast %366 : vector<16xf32> to vector<16x1xf32>
    %cst_132 = arith.constant 3.200000e+01 : f32
    %368 = vector.broadcast %cst_132 : f32 to vector<16x1xf32>
    %369 = arith.divf %367, %368 : vector<16x1xf32>
    %370 = vector.broadcast %362 : vector<16x1xf32> to vector<16x32xf32>
    %371 = arith.subf %358, %370 : vector<16x32xf32>
    %cst_133 = arith.constant 9.99999974E-6 : f32
    %372 = vector.broadcast %cst_133 : f32 to vector<16x1xf32>
    %373 = arith.addf %369, %372 : vector<16x1xf32>
    %374 = math.rsqrt %373 : vector<16x1xf32>
    %375 = vector.broadcast %374 : vector<16x1xf32> to vector<16x32xf32>
    %376 = arith.mulf %371, %375 : vector<16x32xf32>
    %c6 = arith.constant 6 : index
    %c0_134 = arith.constant 0 : index
    %377 = vector.load %arg2[%c6, %c0_134] : memref<24x32xf32, #tpu.memory_space<vmem>>, vector<1x32xf32>
    %378 = vector.broadcast %377 : vector<1x32xf32> to vector<16x32xf32>
    %379 = arith.mulf %376, %378 : vector<16x32xf32>
    %c7 = arith.constant 7 : index
    %c0_135 = arith.constant 0 : index
    %380 = vector.load %arg2[%c7, %c0_135] : memref<24x32xf32, #tpu.memory_space<vmem>>, vector<1x32xf32>
    %381 = vector.broadcast %380 : vector<1x32xf32> to vector<16x32xf32>
    %382 = arith.addf %379, %381 : vector<16x32xf32>
    %c1_136 = arith.constant 1 : index
    %c0_137 = arith.constant 0 : index
    %c0_138 = arith.constant 0 : index
    %383 = vector.load %arg4[%c1_136, %c0_137, %c0_138] : memref<2x32x128xf32, #tpu.memory_space<vmem>>, vector<1x32x128xf32>
    %384 = vector.shape_cast %383 : vector<1x32x128xf32> to vector<32x128xf32>
    %c1_139 = arith.constant 1 : index
    %c0_140 = arith.constant 0 : index
    %385 = vector.load %arg3[%c1_139, %c0_140] : memref<4x128xf32, #tpu.memory_space<vmem>>, vector<1x128xf32>
    %c1_141 = arith.constant 1 : index
    %c0_142 = arith.constant 0 : index
    %c0_143 = arith.constant 0 : index
    %386 = vector.load %arg5[%c1_141, %c0_142, %c0_143] : memref<2x128x32xf32, #tpu.memory_space<vmem>>, vector<1x128x32xf32>
    %387 = vector.shape_cast %386 : vector<1x128x32xf32> to vector<128x32xf32>
    %c16 = arith.constant 16 : index
    %c0_144 = arith.constant 0 : index
    %388 = vector.load %arg2[%c16, %c0_144] : memref<24x32xf32, #tpu.memory_space<vmem>>, vector<1x32xf32>
    %cst_145 = arith.constant dense<0.000000e+00> : vector<16x128xf32>
    %389 = tpu.matmul %382, %384, %cst_145 {dimension_numbers = #tpu.dot_dimension_numbers<[1], [0], [0], [1], [0, 0, 1, 1], [], []>} : vector<16x32xf32>, vector<32x128xf32>, vector<16x128xf32> -> vector<16x128xf32>
    %390 = vector.broadcast %385 : vector<1x128xf32> to vector<16x128xf32>
    %391 = arith.addf %389, %390 : vector<16x128xf32>
    %cst_146 = arith.constant 0.000000e+00 : f32
    %392 = vector.broadcast %cst_146 : f32 to vector<16x128xf32>
    %393 = arith.maximumf %391, %392 : vector<16x128xf32>
    %cst_147 = arith.constant dense<0.000000e+00> : vector<16x32xf32>
    %394 = tpu.matmul %393, %387, %cst_147 {dimension_numbers = #tpu.dot_dimension_numbers<[1], [0], [0], [1], [0, 0, 1, 1], [], []>} : vector<16x128xf32>, vector<128x32xf32>, vector<16x32xf32> -> vector<16x32xf32>
    %395 = vector.broadcast %388 : vector<1x32xf32> to vector<16x32xf32>
    %396 = arith.addf %394, %395 : vector<16x32xf32>
    %cst_148 = arith.constant 5.000000e-01 : f32
    %397 = vector.broadcast %cst_148 : f32 to vector<16x32xf32>
    %398 = arith.mulf %397, %396 : vector<16x32xf32>
    %399 = arith.addf %358, %398 : vector<16x32xf32>
    %cst_149 = arith.constant dense<0.000000e+00> : vector<16xf32>
    %400 = vector.multi_reduction <add>, %399, %cst_149 [1] : vector<16x32xf32> to vector<16xf32>
    %401 = vector.shape_cast %400 : vector<16xf32> to vector<16x1xf32>
    %cst_150 = arith.constant 3.200000e+01 : f32
    %402 = vector.broadcast %cst_150 : f32 to vector<16x1xf32>
    %403 = arith.divf %401, %402 : vector<16x1xf32>
    %404 = vector.broadcast %403 : vector<16x1xf32> to vector<16x32xf32>
    %405 = arith.subf %399, %404 : vector<16x32xf32>
    %406 = arith.mulf %405, %405 : vector<16x32xf32>
    %cst_151 = arith.constant dense<0.000000e+00> : vector<16xf32>
    %407 = vector.multi_reduction <add>, %406, %cst_151 [1] : vector<16x32xf32> to vector<16xf32>
    %408 = vector.shape_cast %407 : vector<16xf32> to vector<16x1xf32>
    %cst_152 = arith.constant 3.200000e+01 : f32
    %409 = vector.broadcast %cst_152 : f32 to vector<16x1xf32>
    %410 = arith.divf %408, %409 : vector<16x1xf32>
    %411 = vector.broadcast %403 : vector<16x1xf32> to vector<16x32xf32>
    %412 = arith.subf %399, %411 : vector<16x32xf32>
    %cst_153 = arith.constant 9.99999974E-6 : f32
    %413 = vector.broadcast %cst_153 : f32 to vector<16x1xf32>
    %414 = arith.addf %410, %413 : vector<16x1xf32>
    %415 = math.rsqrt %414 : vector<16x1xf32>
    %416 = vector.broadcast %415 : vector<16x1xf32> to vector<16x32xf32>
    %417 = arith.mulf %412, %416 : vector<16x32xf32>
    %c8 = arith.constant 8 : index
    %c0_154 = arith.constant 0 : index
    %418 = vector.load %arg2[%c8, %c0_154] : memref<24x32xf32, #tpu.memory_space<vmem>>, vector<1x32xf32>
    %419 = vector.broadcast %418 : vector<1x32xf32> to vector<16x32xf32>
    %420 = arith.mulf %417, %419 : vector<16x32xf32>
    %c9 = arith.constant 9 : index
    %c0_155 = arith.constant 0 : index
    %421 = vector.load %arg2[%c9, %c0_155] : memref<24x32xf32, #tpu.memory_space<vmem>>, vector<1x32xf32>
    %422 = vector.broadcast %421 : vector<1x32xf32> to vector<16x32xf32>
    %423 = arith.addf %420, %422 : vector<16x32xf32>
    %424 = vector.shape_cast %423 : vector<16x32xf32> to vector<2x8x32xf32>
    %c0_156 = arith.constant 0 : index
    %c0_157 = arith.constant 0 : index
    %c0_158 = arith.constant 0 : index
    %425 = vector.load %arg9[%c0_156, %c0_157, %c0_158] : memref<2x8x32xf32, #tpu.memory_space<vmem>>, vector<2x8x32xf32>
    tpu.vector_store %arg9[%c0_156, %c0_157, %c0_158], %424 {strides = array<i32>} : memref<2x8x32xf32, #tpu.memory_space<vmem>>, vector<2x8x32xf32>,
    return
  }
  func.func @transform_0(%arg0: i32) -> (i32, i32, i32) {
    %c0_i32 = arith.constant 0 : i32
    %c0_i32_0 = arith.constant 0 : i32
    %c0_i32_1 = arith.constant 0 : i32
    return %arg0, %c0_i32, %c0_i32_0 : i32, i32, i32
  }
  func.func @transform_1(%arg0: i32) -> (i32, i32) {
    %c0_i32 = arith.constant 0 : i32
    %c0_i32_0 = arith.constant 0 : i32
    %c0_i32_1 = arith.constant 0 : i32
    return %c0_i32, %c0_i32_0 : i32, i32
  }
  func.func @transform_2(%arg0: i32) -> (i32, i32) {
    %c0_i32 = arith.constant 0 : i32
    %c0_i32_0 = arith.constant 0 : i32
    %c0_i32_1 = arith.constant 0 : i32
    return %c0_i32, %c0_i32_0 : i32, i32
  }
  func.func @transform_3(%arg0: i32) -> (i32, i32, i32) {
    %c0_i32 = arith.constant 0 : i32
    %c0_i32_0 = arith.constant 0 : i32
    %c0_i32_1 = arith.constant 0 : i32
    %c0_i32_2 = arith.constant 0 : i32
    return %c0_i32, %c0_i32_0, %c0_i32_1 : i32, i32, i32
  }
  func.func @transform_4(%arg0: i32) -> (i32, i32, i32) {
    %c0_i32 = arith.constant 0 : i32
    %c0_i32_0 = arith.constant 0 : i32
    %c0_i32_1 = arith.constant 0 : i32
    %c0_i32_2 = arith.constant 0 : i32
    return %c0_i32, %c0_i32_0, %c0_i32_1 : i32, i32, i32
  }
  func.func @transform_5(%arg0: i32) -> (i32, i32) {
    %c0_i32 = arith.constant 0 : i32
    %c0_i32_0 = arith.constant 0 : i32
    %c0_i32_1 = arith.constant 0 : i32
    return %c0_i32, %c0_i32_0 : i32, i32
  }
  func.func @transform_6(%arg0: i32) -> (i32, i32) {
    %c0_i32 = arith.constant 0 : i32
    %c0_i32_0 = arith.constant 0 : i32
    %c0_i32_1 = arith.constant 0 : i32
    return %c0_i32, %c0_i32_0 : i32, i32
  }
  func.func @transform_7(%arg0: i32) -> (i32, i32, i32) {
    %c0_i32 = arith.constant 0 : i32
    %c0_i32_0 = arith.constant 0 : i32
    %c0_i32_1 = arith.constant 0 : i32
    %c0_i32_2 = arith.constant 0 : i32
    return %c0_i32, %c0_i32_0, %c0_i32_1 : i32, i32, i32
  }
  func.func @transform_8(%arg0: i32) -> (i32, i32, i32) {
    %c0_i32 = arith.constant 0 : i32
    %c0_i32_0 = arith.constant 0 : i32
    %c0_i32_1 = arith.constant 0 : i32
    return %arg0, %c0_i32, %c0_i32_0 : i32, i32, i32
  }
}

</mosaic_0001>

<bundles_post_ra>
// kernel: conformer_block.1
= control target key start
LH: loop header
LB: loop body
LE: loop exit
PB: predicated region body
PF: predicated region fallthrough
CT: control target
= control target key end

     0   :  { %vm32_vm0 = vcmask 261120   ;;  %s2314_s0 = inlined_call_operand.vmem [shape: f32[2,8,32], index: 0, kind: input, shape index: {}]   ;;  %s2315_s1 = inlined_call_operand.vmem [shape: f32[24,32], index: 1, kind: input, shape index: {}]   ;;  %s2316_s2 = inlined_call_operand.vmem [shape: f32[4,128], index: 2, kind: input, shape index: {}]   ;;  %s2317_s3 = inlined_call_operand.vmem [shape: f32[2,32,128], index: 3, kind: input, shape index: {}]   ;;  %s2318_s4 = inlined_call_operand.vmem [shape: f32[2,128,32], index: 4, kind: input, shape index: {}]   ;;  %s2319_s5 = inlined_call_operand.vmem [shape: f32[32,96], index: 5, kind: input, shape index: {}]   ;;  %s2320_s6 = inlined_call_operand.vmem [shape: f32[32,64], index: 6, kind: input, shape index: {}]   ;;  %s2321_s7 = inlined_call_operand.vmem [shape: f32[2,32,32], index: 7, kind: input, shape index: {}]   ;;  %s2322_s8 = inlined_call_operand.hbm [shape: f32[2,8,32], index: 8, kind: output, shape index: {}]  }
   0x1   :  { %v1746_v0 = vld [vmem:[%s2314_s0] sm:$0xff]  ;;  %v1751_v1 = vld [vmem:[%s2314_s0 + $0x8] sm:$0xff] }
   0x2   :  { %v33_v2 = vsel %vm32_vm0, %v1746_v0, 0.0  ;;  %v36_v3 = vsel %vm32_vm0, %v1751_v1, 0.0 }
   0x3   :  { %34 = vadd.xlane.f32.xlu0 %v33_v2  ;;  %37 = vadd.xlane.f32.xlu1 %v36_v3 }
   0x4   :  { %13 = vsyncpa [#allocation3], 0  ;;  %v1683_v4 = vmov 32.0   ;;  %v95_v21 = vld [vmem:[%s2317_s3 + $0x18] sm:$0xff]  ;;  %v94_v22 = vld [vmem:[%s2317_s3 + $0x10] sm:$0xff]  ;;  %s1684_s23 = smov 96  }
   0x5   :  { %1595 = vrcp.f32 %v1683_v4  ;;  %133 = vmatpush.msra.mxu0 %v95_v21  ;;  %v93_v23 = vld [vmem:[%s2317_s3 + $0x8] sm:$0xff]  ;;  %v92_v24 = vld [vmem:[%s2317_s3] sm:$0xff]  ;;  %v112_v31 = vld [vmem:[%s2318_s4 + $0x78] sm:$0xff]  ;;  %s1685_s24 = smov 88   ;;  %s1686_s25 = smov 120   ;;  %vm268_vm14 = vcmask 64512  }
   0x6   :  { %v111_v32 = vld [vmem:[%s2318_s4 + $0x70] sm:$0xff]  ;;  %147 = vmatpush.msra.mxu1 %v112_v31  ;;  %v110_v33 = vld [vmem:[%s2318_s4 + $0x68] sm:$0xff]  ;;  %v109_v34 = vld [vmem:[%s2318_s4 + $0x60] sm:$0xff]  ;;  %s1687_s26 = smov 56   ;;  %s1688_s27 = smov 80  }
   0x7   :  { %134 = vmatpush.msra.mxu0 %v94_v22  ;;  %v108_v36 = vld [vmem:[%s2318_s4 + $0x58] sm:$0xff]  ;;  %v107_v40 = vld [vmem:[%s2318_s4 + $0x50] sm:$0xff]  ;;  %v106_v43 = vld [vmem:[%s2318_s4 + $0x48] sm:$0xff]  ;;  %s1689_s28 = smov 112   ;;  %s1690_s29 = smov 72  }
   0x8   :  { %148 = vmatpush.msra.mxu1 %v111_v32  ;;  %v105_v46 = vld [vmem:[%s2318_s4 + $0x40] sm:$0xff]  ;;  %v104_v49 = vld [vmem:[%s2318_s4 + $0x38] sm:$0xff]  ;;  %v103_v53 = vld [vmem:[%s2318_s4 + $0x30] sm:$0xff]  ;;  %s1691_s30 = smov 104   ;;  %s1692_s0 = smov 64  }
   0x9   :  { %135 = vmatpush.msra.mxu0 %v93_v23  ;;  %v1567_v52 = vld [vmem:[%s2315_s1] ss:$0 sm:$0xff]  ;;  %v1568_v57 = vld [vmem:[%s2315_s1 + $0x1] ss:$0 sm:$0xff]  ;;  %v102_v58 = vld [vmem:[%s2318_s4 + $0x28] sm:$0xff]  ;;  %s1693_s9 = smov 48  }
   0xa   :  { %149 = vmatpush.msra.mxu1 %v110_v33  ;;  %v101_v61 = vld [vmem:[%s2318_s4 + $0x20] sm:$0xff]  ;;  %v100_v63 = vld [vmem:[%s2318_s4 + $0x18] sm:$0xff]  ;;  %v99_v4 = vld [vmem:[%s2318_s4 + $0x10] sm:$0xff]  ;;  %s1694_s10 = smov 40   ;;  %s1695_s11 = smov [#allocation2]  }
   0xb   :  { %v1596_v5 = vpop.eup %1595  ;;  %136 = vmatpush.msra.mxu0 %v92_v24  ;;  %s1466_s12 = sshll.u32 %s1695_s11, 4  ;;  %s1468_s15 = sshll.u32 %s2322_s8, 4  ;;  %s1467_s12 = int_to_ptr.vmem [resolvable:$true] %s1466_s12  ;;  %s1469_s15 = int_to_ptr.hbm [resolvable:$true] %s1468_s15 }
   0xc   :  { %v40_v6 = vmul.f32 32.0, %v1596_v5  ;;  %vm44_vm1 = vweird.f32 %v1596_v5  ;;  %150 = vmatpush.msra.mxu1 %v109_v34  ;;  %v229_v34 = vld [vmem:[%s2319_s5 + $0x18] sm:$0xff]  ;;  %s1697_s16 = smov 8  }
   0xd   :  { %250 = vmatpush.msrb.mxu0 %v229_v34  ;;  %1548 = vmatpush.msra.mxu3 %v229_v34 }
   0xe   :  { %v41_v7 = vsub.f32 1.0, %v40_v6  ;;  %151 = vmatpush.msra.mxu1 %v108_v36  ;;  %v97_v6 = vld [vmem:[%s2318_s4] sm:$0xff]  ;;  %v227_v36 = vld [vmem:[%s2319_s5 + $0x8] sm:$0xff] }
  0x10   :  { %v42_v8 = vmul.f32 %v1596_v5, %v41_v7  ;;  %152 = vmatpush.msra.mxu1 %v107_v40  ;;  %v1569_v7 = vld [vmem:[%s2316_s2] ss:$0 sm:$0xff] }
  0x12   :  { %v43_v9 = vadd.f32 %v1596_v5, %v42_v8  ;;  %153 = vmatpush.msra.mxu1 %v106_v43 }
  0x14   :  { %v1757_v10 = vsel %vm44_vm1, %v1596_v5, %v43_v9  ;;  %154 = vmatpush.msra.mxu1 %v105_v46  ;;  %v98_v5 = vld [vmem:[%s2318_s4 + $0x8] sm:$0xff] }
  0x16   :  { %155 = vmatpush.msra.mxu1 %v104_v49 }
  0x18   :  { %156 = vmatpush.msra.mxu1 %v103_v53 }
  0x1a   :  { %157 = vmatpush.msra.mxu1 %v102_v58 }
  0x1c   :  { %158 = vmatpush.msra.mxu1 %v101_v61 }
  0x1e   :  { %159 = vmatpush.msra.mxu1 %v100_v63 }
  0x20   :  { %160 = vmatpush.msra.mxu1 %v99_v4  ;;  %v1573_v4 = vld [vmem:[%s2316_s2 + $0x3] ss:$0 sm:$0xff] }
  0x22   :  { %161 = vmatpush.msra.mxu1 %v98_v5 }
  0x24   :  { %162 = vmatpush.msra.mxu1 %v97_v6 }
  0x76   :  { %v35_v11 = vpop.xlane.xlu0 %34  ;;  %v38_v12 = vpop.xlane.xlu1 %37 }
  0x77   :  { %v46_v13 = vmul.f32 %v1757_v10, %v35_v11  ;;  %v47_v14 = vmul.f32 %v1757_v10, %v38_v12 }
  0x79   :  { %v1762_v15 = vsub.f32 %v1746_v0, %v46_v13  ;;  %v1765_v16 = vsub.f32 %v1751_v1, %v47_v14 }
  0x7b   :  { %v50_v17 = vmul.f32 %v1762_v15, %v1762_v15  ;;  %v51_v18 = vmul.f32 %v1765_v16, %v1765_v16 }
  0x7d   :  { %v52_v19 = vsel %vm32_vm0, %v50_v17, 0.0  ;;  %v55_v20 = vsel %vm32_vm0, %v51_v18, 0.0 }
  0x7e   :  { %53 = vadd.xlane.f32.xlu0 %v52_v19  ;;  %56 = vadd.xlane.f32.xlu1 %v55_v20 }
  0xf1   :  { %v54_v25 = vpop.xlane.xlu0 %53  ;;  %v57_v26 = vpop.xlane.xlu1 %56 }
  0xf2   :  { %v58_v27 = vmul.f32 %v54_v25, %v1757_v10  ;;  %v59_v28 = vmul.f32 %v57_v26, %v1757_v10 }
  0xf4   :  { %v60_v29 = vadd.f32 1e-05, %v58_v27  ;;  %v61_v30 = vadd.f32 1e-05, %v59_v28 }
  0xf6   :  { %1597 = vrsqrt.f32 %v60_v29  ;;  %vm78_vm2 = vweird.f32 %v61_v30  ;;  %vm68_vm5 = vweird.f32 %v60_v29 }
  0xf7   :  { %1599 = vrsqrt.f32 %v61_v30 }
  0xfc   :  { %v1598_v35 = vpop.eup %1597 }
  0xfd   :  { %v1600_v37 = vpop.eup %1599  ;;  %v63_v38 = vmul.f32 %v1598_v35, %v60_v29  ;;  %vm69_vm4 = vweird.f32 %v1598_v35 }
  0xfe   :  { %v73_v39 = vmul.f32 %v1600_v37, %v61_v30  ;;  %vm79_vm3 = vweird.f32 %v1600_v37  ;;  %vm70_vm7 = vmor %vm68_vm5, %vm69_vm4 }
  0xff   :  { %v64_v41 = vmul.f32 %v1598_v35, %v63_v38  ;;  %vm80_vm6 = vmor %vm78_vm2, %vm79_vm3 }
 0x100   :  { %v74_v42 = vmul.f32 %v1600_v37, %v73_v39 }
 0x101   :  { %v65_v44 = vmul.f32 0.5, %v64_v41 }
 0x102   :  { %v75_v45 = vmul.f32 0.5, %v74_v42 }
 0x103   :  { %v66_v47 = vsub.f32 1.5, %v65_v44 }
 0x104   :  { %v76_v48 = vsub.f32 1.5, %v75_v45 }
 0x105   :  { %v67_v50 = vmul.f32 %v1598_v35, %v66_v47 }
 0x106   :  { %v77_v51 = vmul.f32 %v1600_v37, %v76_v48 }
 0x107   :  { %v71_v54 = vsel %vm70_vm7, %v1598_v35, %v67_v50  ;;  %v228_v35 = vld [vmem:[%s2319_s5 + $0x10] sm:$0xff] }
 0x108   :  { %v81_v55 = vsel %vm80_vm6, %v1600_v37, %v77_v51  ;;  %v82_v56 = vmul.f32 %v71_v54, %v1762_v15  ;;  %v1570_v15 = vld [vmem:[%s2315_s1 + $0xa] ss:$0 sm:$0xff]  ;;  %251 = vmatpush.msrb.mxu0 %v228_v35  ;;  %1549 = vmatpush.msra.mxu3 %v228_v35  ;;  %v226_v37 = vld [vmem:[%s2319_s5] sm:$0xff] }
 0x109   :  { %v83_v60 = vmul.f32 %v81_v55, %v1765_v16 }
 0x10a   :  { %v86_v59 = vmul.f32 %v1567_v52, %v82_v56  ;;  %252 = vmatpush.msrb.mxu0 %v227_v36  ;;  %1550 = vmatpush.msra.mxu3 %v227_v36  ;;  %v1572_v56 = vld [vmem:[%s2315_s1 + $0x3] ss:$0 sm:$0xff] }
 0x10b   :  { %v87_v2 = vmul.f32 %v1567_v52, %v83_v60  ;;  %v1571_v52 = vld [vmem:[%s2315_s1 + $0x2] ss:$0 sm:$0xff] }
 0x10c   :  { %v90_v62 = vadd.f32 %v1568_v57, %v86_v59  ;;  %253 = vmatpush.msrb.mxu0 %v226_v37  ;;  %1551 = vmatpush.msra.mxu3 %v226_v37 }
 0x10d   :  { %v91_v3 = vadd.f32 %v1568_v57, %v87_v2 }
 0x10e   :  { %1480 = vmatmul.msk.f32.vlgmr.msra.gmra.mxu0 %vm32_vm0, %v90_v62 }
 0x116   :  { %1481 = vmatmul.msk.f32.gmra.mxu0 %vm32_vm0, %v91_v3 }
 0x18b   :  { %v138_v8 = vpop.f32.mrf.mxu0 }
 0x18c   :  { %v139_v9 = vadd.f32 %v1569_v7, %v138_v8 }
 0x18e   :  { %v144_v11 = vmax.f32 %v139_v9, 0.0 }
 0x190   :  { %163 = vmatmul.f32.vlgmr.msra.gmra.mxu1 %v144_v11 }
 0x193   :  { %v141_v12 = vpop.f32.mrf.mxu0 }
 0x194   :  { %v142_v13 = vadd.f32 %v1569_v7, %v141_v12 }
 0x196   :  { %v145_v14 = vmax.f32 %v142_v13, 0.0 }
 0x198   :  { %166 = vmatmul.f32.gmra.mxu1 %v145_v14 }
 0x20d   :  { %v164_v16 = vpop.f32.mrf.mxu1 }
 0x20e   :  { %v165_v17 = vadd.f32 %v1570_v15, %v164_v16 }
 0x210   :  { %v170_v18 = vmul.f32 0.5, %v165_v17 }
 0x212   :  { %v1852_v19 = vadd.f32 %v170_v18, %v1746_v0 }
 0x214   :  { %v174_v20 = vsel %vm32_vm0, %v1852_v19, 0.0 }
 0x215   :  { %v167_v21 = vpop.f32.mrf.mxu1  ;;  %175 = vadd.xlane.f32.xlu2 %v174_v20 }
 0x216   :  { %v168_v22 = vadd.f32 %v1570_v15, %v167_v21 }
 0x218   :  { %v171_v23 = vmul.f32 0.5, %v168_v22 }
 0x21a   :  { %v1857_v24 = vadd.f32 %v171_v23, %v1751_v1 }
 0x21c   :  { %v177_v25 = vsel %vm32_vm0, %v1857_v24, 0.0 }
 0x21d   :  { %178 = vadd.xlane.f32.xlu0 %v177_v25 }
 0x288   :  { %v176_v26 = vpop.xlane.xlu2 %175 }
 0x289   :  { %v180_v27 = vmul.f32 %v176_v26, %v1757_v10 }
 0x28b   :  { %v182_v0 = vsub.f32 %v1852_v19, %v180_v27 }
 0x28d   :  { %v184_v28 = vmul.f32 %v182_v0, %v182_v0 }
 0x28f   :  { %v186_v29 = vsel %vm32_vm0, %v184_v28, 0.0 }
 0x290   :  { %v179_v30 = vpop.xlane.xlu0 %178  ;;  %187 = vadd.xlane.f32.xlu2 %v186_v29 }
 0x291   :  { %v181_v31 = vmul.f32 %v179_v30, %v1757_v10 }
 0x293   :  { %v183_v32 = vsub.f32 %v1857_v24, %v181_v31 }
 0x295   :  { %v185_v1 = vmul.f32 %v183_v32, %v183_v32 }
 0x297   :  { %v189_v33 = vsel %vm32_vm0, %v185_v1, 0.0 }
 0x298   :  { %190 = vadd.xlane.f32.xlu1 %v189_v33 }
 0x303   :  { %v188_v38 = vpop.xlane.xlu2 %187 }
 0x304   :  { %v192_v39 = vmul.f32 %v188_v38, %v1757_v10 }
 0x306   :  { %v194_v40 = vadd.f32 1e-05, %v192_v39 }
 0x308   :  { %1601 = vrsqrt.f32 %v194_v40  ;;  %vm202_vm9 = vweird.f32 %v194_v40 }
 0x30b   :  { %v191_v41 = vpop.xlane.xlu1 %190 }
 0x30c   :  { %v193_v42 = vmul.f32 %v191_v41, %v1757_v10 }
 0x30e   :  { %v1602_v43 = vpop.eup %1601  ;;  %v195_v44 = vadd.f32 1e-05, %v193_v42 }
 0x30f   :  { %v197_v45 = vmul.f32 %v1602_v43, %v194_v40  ;;  %vm203_vm8 = vweird.f32 %v1602_v43 }
 0x310   :  { %1603 = vrsqrt.f32 %v195_v44  ;;  %vm204_vm10 = vmor %vm202_vm9, %vm203_vm8  ;;  %vm212_vm12 = vweird.f32 %v195_v44 }
 0x311   :  { %v198_v46 = vmul.f32 %v1602_v43, %v197_v45 }
 0x313   :  { %v199_v47 = vmul.f32 0.5, %v198_v46 }
 0x315   :  { %v200_v48 = vsub.f32 1.5, %v199_v47 }
 0x316   :  { %v1604_v49 = vpop.eup %1603 }
 0x317   :  { %v201_v50 = vmul.f32 %v1602_v43, %v200_v48  ;;  %v207_v51 = vmul.f32 %v1604_v49, %v195_v44  ;;  %vm213_vm11 = vweird.f32 %v1604_v49 }
 0x318   :  { %vm214_vm13 = vmor %vm212_vm12, %vm213_vm11 }
 0x319   :  { %v205_v53 = vsel %vm204_vm10, %v1602_v43, %v201_v50  ;;  %v208_v54 = vmul.f32 %v1604_v49, %v207_v51 }
 0x31a   :  { %v216_v55 = vmul.f32 %v205_v53, %v182_v0 }
 0x31b   :  { %v209_v57 = vmul.f32 0.5, %v208_v54 }
 0x31c   :  { %v220_v58 = vmul.f32 %v1571_v52, %v216_v55 }
 0x31d   :  { %v210_v59 = vsub.f32 1.5, %v209_v57 }
 0x31e   :  { %v224_v60 = vadd.f32 %v1572_v56, %v220_v58 }
 0x31f   :  { %v211_v61 = vmul.f32 %v1604_v49, %v210_v59 }
 0x320   :  { %1482 = vmatmul.msk.f32.vlgmr.msrb.gmra.mxu0 %vm32_vm0, %v224_v60 }
 0x321   :  { %v215_v62 = vsel %vm214_vm13, %v1604_v49, %v211_v61 }
 0x322   :  { %v217_v63 = vmul.f32 %v215_v62, %v183_v32 }
 0x324   :  { %v221_v2 = vmul.f32 %v1571_v52, %v217_v63 }
 0x326   :  { %v225_v3 = vadd.f32 %v1572_v56, %v221_v2 }
 0x328   :  { %1483 = vmatmul.msk.f32.vlgmr.msra.gmra.mxu3 %vm32_vm0, %v225_v3 }
 0x39d   :  { %v255_v5 = vpop.f32.mrf.mxu0 }
 0x39e   :  { %v1892_v6 = vadd.f32 %v1573_v4, %v255_v5 }
 0x3a0   :  { %266 = vrot.lane.b32.xlu2 %v1892_v6, %s1684_s23 }
 0x3ab   :  { %v258_v7 = vpop.f32.mrf.mxu3 }
 0x3ac   :  { %v1896_v8 = vadd.f32 %v1573_v4, %v258_v7 }
 0x3ae   :  { %294 = vrot.lane.b32.xlu1 %v1896_v8, %s1684_s23  ;;  %426 = vrot.lane.b32.xlu2 %v1896_v8, %s1685_s24 }
 0x3b6   :  { %424 = vrot.lane.b32.xlu2 %v1896_v8, %s1686_s25 }
 0x3be   :  { %398 = vrot.lane.b32.xlu2 %v1892_v6, %s1685_s24 }
 0x3c6   :  { %396 = vrot.lane.b32.xlu2 %v1892_v6, %s1686_s25 }
 0x3ce   :  { %502 = vrot.lane.b32.xlu2 %v1896_v8, %s1687_s26 }
 0x3d6   :  { %588 = vrot.lane.b32.xlu2 %v1892_v6, %s1688_s27 }
 0x3de   :  { %586 = vrot.lane.b32.xlu2 %v1892_v6, %s1689_s28 }
 0x3e6   :  { %616 = vrot.lane.b32.xlu2 %v1896_v8, %s1688_s27 }
 0x3ee   :  { %751 = vrot.lane.b32.xlu2 %v1892_v6, %s1690_s29 }
 0x3f6   :  { %749 = vrot.lane.b32.xlu2 %v1892_v6, %s1691_s30 }
 0x3fa   :  { %v267_v9 = vpop.permute.xlu2 %266 }
 0x3fb   :  { %1484 = vmatpush.xpose.msk.msrb.mxu3 %vm268_vm14, %v267_v9 }
 0x3fe   :  { %779 = vrot.lane.b32.xlu2 %v1896_v8, %s1690_s29  ;;  %1485 = vmatmul.msk.f32.vlgmr.msrb.gmra.mxu3 %vm268_vm14, %v1892_v6 }
 0x408   :  { %v427_v11 = vpop.permute.xlu2 %426 }
 0x410   :  { %v425_v12 = vpop.permute.xlu2 %424 }
 0x418   :  { %v399_v13 = vpop.permute.xlu2 %398 }
 0x419   :  { %1490 = vmatpush.xpose.msk.msra.mxu2 %vm268_vm14, %v399_v13 }
 0x420   :  { %v295_v14 = vpop.permute.xlu1 %294  ;;  %v397_v15 = vpop.permute.xlu2 %396 }
 0x421   :  { %1486 = vmatpush.xpose.msk.msra.mxu3 %vm268_vm14, %v295_v14  ;;  %1491 = vmatmul.msk.f32.vlgmr.msra.gmra.mxu2 %vm268_vm14, %v397_v15 }
 0x424   :  { %1487 = vmatmul.msk.f32.vlgmr.msra.gmra.mxu3 %vm268_vm14, %v1896_v8 }
 0x428   :  { %v503_v16 = vpop.permute.xlu2 %502 }
 0x429   :  { %523 = vmatpush.msrb.mxu2 %v503_v16 }
 0x430   :  { %v589_v17 = vpop.permute.xlu2 %588 }
 0x431   :  { %1500 = vmatpush.xpose.msk.msra.mxu2 %vm268_vm14, %v589_v17 }
 0x438   :  { %v587_v18 = vpop.permute.xlu2 %586 }
 0x440   :  { %v617_v20 = vpop.permute.xlu2 %616 }
 0x441   :  { %1502 = vmatpush.xpose.msk.msrb.mxu1 %vm268_vm14, %v617_v20 }
 0x448   :  { %v752_v21 = vpop.permute.xlu2 %751 }
 0x449   :  { %1508 = vmatpush.xpose.msk.msra.mxu1 %vm268_vm14, %v752_v21 }
 0x450   :  { %v750_v52 = vpop.permute.xlu2 %749 }
 0x481   :  { %v290_v22 = vpop.f32.mrf.mxu3 }
 0x482   :  { %v320_v23 = vmul.f32 0.35355338, %v290_v22 }
 0x484   :  { %v322_v25 = vsel %vm268_vm14, %v320_v23, -inf }
 0x485   :  { %323 = vmax.xlane.f32.xlu0 %v322_v25 }
 0x4a4   :  { %v421_v45 = vpop.f32.mrf.mxu2 }
 0x4a5   :  { %v452_v46 = vmul.f32 0.35355338, %v421_v45 }
 0x4a7   :  { %v317_v26 = vpop.f32.mrf.mxu3  ;;  %v454_v47 = vsel %vm268_vm14, %v452_v46, -inf }
 0x4a8   :  { %v1926_v27 = vmul.f32 0.35355338, %v317_v26 }
 0x4aa   :  { %v325_v0 = vsel %vm268_vm14, %v1926_v27, -inf }
 0x4ab   :  { %326 = vmax.xlane.f32.xlu2 %v325_v0 }
 0x4f8   :  { %v324_v28 = vpop.xlane.xlu0 %323 }
 0x4f9   :  { %v328_v29 = vsub.f32 %v320_v23, %v324_v28 }
 0x4fb   :  { %v330_v30 = vmul.f32 1.442695, %v328_v29 }
 0x4fd   :  { %1605 = vpow2.f32 %v330_v30  ;;  %v262_v30 = vld [vmem:[%s2321_s7 + $0x8] sm:$0xff] }
 0x503   :  { %v1606_v31 = vpop.eup %1605 }
 0x504   :  { %v334_v32 = vsel %vm268_vm14, %v1606_v31, 0.0 }
 0x505   :  { %335 = vadd.xlane.f32.xlu0 %v334_v32 }
 0x519   :  { %344 = vrot.lane.b32.xlu0 %v1892_v6, %s1692_s0 }
 0x578   :  { %v336_v1 = vpop.xlane.xlu0 %335 }
 0x579   :  { %1607 = vrcp.f32 %v336_v1 }
 0x57f   :  { %v1608_v33 = vpop.eup %1607 }
 0x580   :  { %v342_v34 = vmul.f32 %v1608_v33, %v1606_v31 }
 0x58b   :  { %v345_v35 = vpop.permute.xlu0 %344 }
 0x58c   :  { %365 = vmatpush.msrb.mxu3 %v345_v35 }
 0x58d   :  { %1488 = vmatmul.msk.f32.vlgmr.msrb.gmra.mxu3 %vm268_vm14, %v342_v34 }
 0x58e   :  { %1492 = vmatpush.xpose.msk.msra.mxu3 %vm268_vm14, %v427_v11  ;;  %v780_v11 = vpop.permute.xlu2 %779 }
 0x592   :  { %549 = vmatpush.msrb.mxu3 %v262_v30 }
 0x595   :  { %1493 = vmatmul.msk.f32.vlgmr.msra.gmra.mxu3 %vm268_vm14, %v425_v12 }
 0x596   :  { %v327_v12 = vpop.xlane.xlu2 %326 }
 0x597   :  { %v329_v26 = vsub.f32 %v1926_v27, %v327_v12 }
 0x599   :  { %v332_v0 = vmul.f32 1.442695, %v329_v26 }
 0x610   :  { %v1935_v36 = vpop.f32.mrf.mxu3 }
 0x618   :  { %v449_v37 = vpop.f32.mrf.mxu3 }
 0x619   :  { %v453_v38 = vmul.f32 0.35355338, %v449_v37 }
 0x61b   :  { %v457_v39 = vsel %vm268_vm14, %v453_v38, -inf }
 0x61c   :  { %458 = vmax.xlane.f32.xlu1 %v457_v39 }
 0x68f   :  { %v459_v40 = vpop.xlane.xlu1 %458 }
 0x690   :  { %v461_v41 = vsub.f32 %v453_v38, %v459_v40 }
 0x692   :  { %v464_v42 = vmul.f32 1.442695, %v461_v41 }
 0x694   :  { %1609 = vpow2.f32 %v464_v42 }
 0x69a   :  { %v1610_v43 = vpop.eup %1609 }
 0x69b   :  { %v469_v44 = vsel %vm268_vm14, %v1610_v43, 0.0 }
 0x69c   :  { %470 = vadd.xlane.f32.xlu0 %v469_v44 }
 0x6b0   :  { %614 = vrot.lane.b32.xlu0 %v1896_v8, %s1689_s28 }
 0x6b8   :  { %777 = vrot.lane.b32.xlu0 %v1896_v8, %s1691_s30 }
 0x6e2   :  { %455 = vmax.xlane.f32.xlu0 %v454_v47 }
 0x6f6   :  { %370 = vrot.lane.b32.xlu0 %v1896_v8, %s1692_s0 }
 0x70f   :  { %v471_v48 = vpop.xlane.xlu0 %470 }
 0x710   :  { %1611 = vrcp.f32 %v471_v48 }
 0x716   :  { %v1612_v49 = vpop.eup %1611 }
 0x717   :  { %v475_v50 = vmul.f32 %v1612_v49, %v1610_v43 }
 0x719   :  { %1495 = vmatmul.msk.f32.vlgmr.msrb.gmra.mxu2 %vm268_vm14, %v475_v50 }
 0x721   :  { %1501 = vmatmul.msk.f32.vlgmr.msra.gmra.mxu2 %vm268_vm14, %v587_v18 }
 0x722   :  { %v615_v51 = vpop.permute.xlu0 %614 }
 0x723   :  { %1503 = vmatmul.msk.f32.vlgmr.msrb.gmra.mxu1 %vm268_vm14, %v615_v51  ;;  %v263_v51 = vld [vmem:[%s2321_s7 + $0x10] sm:$0xff] }
 0x72a   :  { %v1949_v53 = vpop.permute.xlu0 %777 }
 0x72b   :  { %1509 = vmatmul.msk.f32.vlgmr.msra.gmra.mxu1 %vm268_vm14, %v750_v52 }
 0x755   :  { %v456_v54 = vpop.xlane.xlu0 %455 }
 0x756   :  { %v460_v55 = vsub.f32 %v452_v46, %v456_v54  ;;  %v261_v46 = vld [vmem:[%s2321_s7] sm:$0xff] }
 0x758   :  { %v462_v56 = vmul.f32 1.442695, %v460_v55 }
 0x75a   :  { %1613 = vpow2.f32 %v462_v56 }
 0x760   :  { %v1951_v57 = vpop.eup %1613 }
 0x761   :  { %v466_v58 = vsel %vm268_vm14, %v1951_v57, 0.0 }
 0x762   :  { %467 = vadd.xlane.f32.xlu2 %v466_v58 }
 0x768   :  { %v371_v59 = vpop.permute.xlu0 %370 }
 0x769   :  { %391 = vmatpush.msra.mxu0 %v371_v59 }
 0x79c   :  { %v1955_v60 = vpop.f32.mrf.mxu2 }
 0x7a0   :  { %v639_v61 = vpop.f32.mrf.mxu1 }
 0x7a1   :  { %v643_v62 = vmul.f32 0.35355338, %v639_v61 }
 0x7a3   :  { %v647_v63 = vsel %vm268_vm14, %v643_v62, -inf }
 0x7a4   :  { %v611_v2 = vpop.f32.mrf.mxu2  ;;  %648 = vmax.xlane.f32.xlu2 %v647_v63 }
 0x7a5   :  { %v642_v3 = vmul.f32 0.35355338, %v611_v2  ;;  %v264_v2 = vld [vmem:[%s2321_s7 + $0x18] sm:$0xff] }
 0x7a7   :  { %v644_v4 = vsel %vm268_vm14, %v642_v3, -inf }
 0x7a8   :  { %645 = vmax.xlane.f32.xlu1 %v644_v4  ;;  %v774_v5 = vpop.f32.mrf.mxu1 }
 0x7a9   :  { %v805_v7 = vmul.f32 0.35355338, %v774_v5 }
 0x7ab   :  { %v807_v9 = vsel %vm268_vm14, %v805_v7, -inf }
 0x7ac   :  { %808 = vmax.xlane.f32.xlu2 %v807_v9 }
 0x7d5   :  { %v468_v13 = vpop.xlane.xlu2 %467 }
 0x817   :  { %v649_v14 = vpop.xlane.xlu2 %648 }
 0x818   :  { %v651_v15 = vsub.f32 %v643_v62, %v649_v14 }
 0x81a   :  { %v654_v16 = vmul.f32 1.442695, %v651_v15 }
 0x81b   :  { %v646_v17 = vpop.xlane.xlu1 %645 }
 0x81c   :  { %1615 = vpow2.f32 %v654_v16  ;;  %v650_v18 = vsub.f32 %v642_v3, %v646_v17 }
 0x81e   :  { %v652_v20 = vmul.f32 1.442695, %v650_v18 }
 0x81f   :  { %v809_v31 = vpop.xlane.xlu2 %808 }
 0x820   :  { %1617 = vpow2.f32 %v652_v20  ;;  %v813_v1 = vsub.f32 %v805_v7, %v809_v31 }
 0x821   :  { %1619 = vpow2.f32 %v332_v0 }
 0x822   :  { %v1960_v21 = vpop.eup %1615  ;;  %v815_v34 = vmul.f32 1.442695, %v813_v1 }
 0x823   :  { %v659_v22 = vsel %vm268_vm14, %v1960_v21, 0.0 }
 0x824   :  { %660 = vadd.xlane.f32.xlu2 %v659_v22  ;;  %1621 = vpow2.f32 %v815_v34  ;;  %v1574_v22 = vld [vmem:[%s2315_s1 + $0xb] ss:$0 sm:$0xff] }
 0x826   :  { %v1618_v23 = vpop.eup %1617 }
 0x827   :  { %v656_v25 = vsel %vm268_vm14, %v1618_v23, 0.0  ;;  %v1620_v28 = vpop.eup %1619 }
 0x828   :  { %657 = vadd.xlane.f32.xlu1 %v656_v25  ;;  %v337_v29 = vsel %vm268_vm14, %v1620_v28, 0.0 }
 0x82a   :  { %v1622_v35 = vpop.eup %1621 }
 0x82b   :  { %v819_v37 = vsel %vm268_vm14, %v1622_v35, 0.0 }
 0x83c   :  { %692 = vrot.lane.b32.xlu2 %v1896_v8, %s1693_s9 }
 0x841   :  { %666 = vrot.lane.b32.xlu1 %v1892_v6, %s1693_s9 }
 0x844   :  { %829 = vrot.lane.b32.xlu2 %v1892_v6, %s1694_s10 }
 0x86b   :  { %338 = vadd.xlane.f32.xlu1 %v337_v29 }
 0x884   :  { %476 = vrot.lane.b32.xlu1 %v1892_v6, %s1687_s26 }
 0x897   :  { %v661_v32 = vpop.xlane.xlu2 %660 }
 0x89b   :  { %v658_v27 = vpop.xlane.xlu1 %657 }
 0x89c   :  { %1623 = vrcp.f32 %v658_v27 }
 0x89f   :  { %v693_v33 = vpop.permute.xlu2 %692 }
 0x8a0   :  { %713 = vmatpush.msra.mxu3 %v693_v33 }
 0x8a2   :  { %v1624_v38 = vpop.eup %1623 }
 0x8a3   :  { %v664_v39 = vmul.f32 %v1624_v38, %v1618_v23  ;;  %v973_v38 = vld [vmem:[%s2320_s6 + $0x18] sm:$0xff] }
 0x8ae   :  { %820 = vadd.xlane.f32.xlu1 %v819_v37 }
 0x8b3   :  { %v667_v40 = vpop.permute.xlu1 %666 }
 0x8b4   :  { %687 = vmatpush.msrb.mxu2 %v667_v40  ;;  %v970_v40 = vld [vmem:[%s2320_s6] sm:$0xff] }
 0x8b5   :  { %1504 = vmatmul.msk.f32.vlgmr.msrb.gmra.mxu2 %vm268_vm14, %v664_v39  ;;  %v972_v39 = vld [vmem:[%s2320_s6 + $0x10] sm:$0xff] }
 0x8b6   :  { %1510 = vmatpush.xpose.msk.msra.mxu2 %vm268_vm14, %v780_v11 }
 0x8ba   :  { %902 = vmatpush.msrb.mxu2 %v264_v2 }
 0x8bd   :  { %1511 = vmatmul.msk.f32.vlgmr.msra.gmra.mxu2 %vm268_vm14, %v1949_v53  ;;  %v830_v53 = vpop.permute.xlu2 %829 }
 0x8de   :  { %v339_v6 = vpop.xlane.xlu1 %338 }
 0x8df   :  { %1625 = vrcp.f32 %v339_v6 }
 0x8e0   :  { %1627 = vrcp.f32 %v468_v13 }
 0x8e1   :  { %1629 = vrcp.f32 %v661_v32 }
 0x8e5   :  { %v1626_v41 = vpop.eup %1625 }
 0x8e6   :  { %v343_v42 = vmul.f32 %v1626_v41, %v1620_v28  ;;  %v1628_v43 = vpop.eup %1627 }
 0x8e7   :  { %v474_v44 = vmul.f32 %v1628_v43, %v1951_v57  ;;  %v1630_v55 = vpop.eup %1629 }
 0x8e8   :  { %1489 = vmatmul.msk.f32.vlgmr.msra.gmra.mxu0 %vm268_vm14, %v343_v42  ;;  %v665_v56 = vmul.f32 %v1630_v55, %v1960_v21 }
 0x8f6   :  { %v477_v45 = vpop.permute.xlu1 %476 }
 0x8f7   :  { %497 = vmatpush.msrb.mxu0 %v477_v45 }
 0x8f8   :  { %1494 = vmatmul.msk.f32.vlgmr.msrb.gmra.mxu0 %vm268_vm14, %v474_v44 }
 0x8f9   :  { %578 = vmatpush.msra.mxu0 %v261_v46 }
 0x8fb   :  { %739 = vmatpush.msrb.mxu0 %v263_v51 }
 0x900   :  { %1498 = vmatmul.msk.f32.vlgmr.msra.gmra.mxu0 %vm268_vm14, %v1935_v36 }
 0x921   :  { %v821_v54 = vpop.xlane.xlu1 %820 }
 0x922   :  { %1631 = vrcp.f32 %v821_v54 }
 0x938   :  { %v689_v47 = vpop.f32.mrf.mxu2 }
 0x940   :  { %v802_v48 = vpop.f32.mrf.mxu2 }
 0x941   :  { %v806_v49 = vmul.f32 0.35355338, %v802_v48 }
 0x943   :  { %v810_v50 = vsel %vm268_vm14, %v806_v49, -inf }
 0x944   :  { %811 = vmax.xlane.f32.xlu0 %v810_v50 }
 0x958   :  { %855 = vrot.lane.b32.xlu0 %v1896_v8, %s1694_s10  ;;  %v1632_v8 = vpop.eup %1631 }
 0x959   :  { %v827_v57 = vmul.f32 %v1632_v8, %v1622_v35 }
 0x965   :  { %v393_v52 = vpop.f32.mrf.mxu0 }
 0x966   :  { %1499 = vmatmul.msk.f32.gmra.mxu0 %vm268_vm14, %v393_v52  ;;  %v1576_v52 = vld [vmem:[%s2315_s1 + $0x5] ss:$0 sm:$0xff] }
 0x96e   :  { %1506 = vmatmul.msk.f32.vlgmr.msrb.gmra.mxu0 %vm268_vm14, %v689_v47 }
 0x975   :  { %v499_v36 = vpop.f32.mrf.mxu0 }
 0x976   :  { %1496 = vmatmul.msk.f32.vlgmr.msrb.gmra.mxu3 %vm268_vm14, %v499_v36 }
 0x977   :  { %850 = vmatpush.msrb.mxu3 %v830_v53 }
 0x97d   :  { %v580_v3 = vpop.f32.mrf.mxu0 }
 0x97e   :  { %1497 = vmatmul.msk.f32.gmra.mxu3 %vm268_vm14, %v1955_v60 }
 0x986   :  { %1505 = vmatmul.msk.f32.vlgmr.msra.gmra.mxu3 %vm268_vm14, %v665_v56 }
 0x987   :  { %994 = vmatpush.msra.mxu3 %v973_v38 }
 0x989   :  { %995 = vmatpush.msra.mxu3 %v972_v39 }
 0x98e   :  { %1512 = vmatmul.msk.f32.vlgmr.msrb.gmra.mxu3 %vm268_vm14, %v827_v57 }
 0x9b7   :  { %v812_v58 = vpop.xlane.xlu0 %811 }
 0x9b8   :  { %v814_v59 = vsub.f32 %v806_v49, %v812_v58  ;;  %v1575_v49 = vld [vmem:[%s2315_s1 + $0x4] ss:$0 sm:$0xff]  ;;  %v1577_v58 = vld [vmem:[%s2316_s2 + $0x2] ss:$0 sm:$0xff] }
 0x9ba   :  { %v817_v61 = vmul.f32 1.442695, %v814_v59 }
 0x9bc   :  { %1633 = vpow2.f32 %v817_v61 }
 0x9c2   :  { %v1634_v62 = vpop.eup %1633 }
 0x9c3   :  { %v822_v63 = vsel %vm268_vm14, %v1634_v62, 0.0 }
 0x9c4   :  { %823 = vadd.xlane.f32.xlu2 %v822_v63 }
 0x9ca   :  { %v856_v60 = vpop.permute.xlu0 %855 }
 0x9cb   :  { %876 = vmatpush.msrb.mxu1 %v856_v60 }
 0x9e3   :  { %v583_v5 = vpop.f32.mrf.mxu0 }
 0x9eb   :  { %v741_v17 = vpop.f32.mrf.mxu0 }
 0x9f9   :  { %v551_v4 = vpop.f32.mrf.mxu3 }
 0x9fa   :  { %v581_v16 = vadd.f32 %v580_v3, %v551_v4 }
 0x9fc   :  { %v747_v18 = vadd.f32 %v741_v17, %v581_v16 }
 0xa01   :  { %v554_v7 = vpop.f32.mrf.mxu3 }
 0xa02   :  { %v584_v9 = vadd.f32 %v583_v5, %v554_v7 }
 0xa09   :  { %v715_v11 = vpop.f32.mrf.mxu3 }
 0xa0a   :  { %1507 = vmatmul.msk.f32.gmra.mxu0 %vm268_vm14, %v715_v11 }
 0xa11   :  { %v852_v12 = vpop.f32.mrf.mxu3 }
 0xa12   :  { %1514 = vmatmul.msk.f32.vlgmr.msrb.gmra.mxu2 %vm268_vm14, %v852_v12 }
 0xa37   :  { %v824_v13 = vpop.xlane.xlu2 %823 }
 0xa38   :  { %1635 = vrcp.f32 %v824_v13 }
 0xa3e   :  { %v1636_v14 = vpop.eup %1635 }
 0xa3f   :  { %v828_v15 = vmul.f32 %v1636_v14, %v1634_v62 }
 0xa41   :  { %1513 = vmatmul.msk.f32.vlgmr.msrb.gmra.mxu1 %vm268_vm14, %v828_v15 }
 0xa87   :  { %v744_v1 = vpop.f32.mrf.mxu0 }
 0xa95   :  { %v904_v20 = vpop.f32.mrf.mxu2 }
 0xa96   :  { %v910_v21 = vadd.f32 %v904_v20, %v747_v18 }
 0xa98   :  { %v912_v23 = vadd.f32 %v910_v21, %v1852_v19  ;;  %v748_v19 = vadd.f32 %v744_v1, %v584_v9 }
 0xa9a   :  { %v2014_v25 = vadd.f32 %v1574_v22, %v912_v23 }
 0xa9c   :  { %v918_v26 = vsel %vm32_vm0, %v2014_v25, 0.0 }
 0xa9d   :  { %919 = vadd.xlane.f32.xlu1 %v918_v26 }
 0xabe   :  { %v878_v0 = vpop.f32.mrf.mxu1 }
 0xabf   :  { %1515 = vmatmul.msk.f32.gmra.mxu2 %vm268_vm14, %v878_v0 }
 0xb10   :  { %v920_v28 = vpop.xlane.xlu1 %919 }
 0xb11   :  { %v924_v29 = vmul.f32 %v920_v28, %v1757_v10 }
 0xb13   :  { %v926_v30 = vsub.f32 %v2014_v25, %v924_v29 }
 0xb15   :  { %v928_v31 = vmul.f32 %v926_v30, %v926_v30 }
 0xb17   :  { %v930_v32 = vsel %vm32_vm0, %v928_v31, 0.0 }
 0xb18   :  { %931 = vadd.xlane.f32.xlu0 %v930_v32 }
 0xb42   :  { %v907_v33 = vpop.f32.mrf.mxu2 }
 0xb43   :  { %v911_v34 = vadd.f32 %v907_v33, %v748_v19 }
 0xb45   :  { %v913_v27 = vadd.f32 %v911_v34, %v1857_v24  ;;  %v971_v24 = vld [vmem:[%s2320_s6 + $0x8] sm:$0xff] }
 0xb46   :  { %996 = vmatpush.msra.mxu3 %v971_v24 }
 0xb47   :  { %v2023_v35 = vadd.f32 %v1574_v22, %v913_v27 }
 0xb48   :  { %997 = vmatpush.msra.mxu3 %v970_v40 }
 0xb49   :  { %v921_v37 = vsel %vm32_vm0, %v2023_v35, 0.0 }
 0xb4a   :  { %922 = vadd.xlane.f32.xlu1 %v921_v37 }
 0xb8b   :  { %v932_v6 = vpop.xlane.xlu0 %931 }
 0xb8c   :  { %v936_v41 = vmul.f32 %v932_v6, %v1757_v10 }
 0xb8e   :  { %v938_v42 = vadd.f32 1e-05, %v936_v41 }
 0xb90   :  { %1637 = vrsqrt.f32 %v938_v42  ;;  %vm946_vm1 = vweird.f32 %v938_v42 }
 0xb96   :  { %v1638_v43 = vpop.eup %1637 }
 0xb97   :  { %v941_v44 = vmul.f32 %v1638_v43, %v938_v42  ;;  %vm947_vm15 = vweird.f32 %v1638_v43 }
 0xb98   :  { %vm948_vm2 = vmor %vm946_vm1, %vm947_vm15 }
 0xb99   :  { %v942_v45 = vmul.f32 %v1638_v43, %v941_v44  ;;  %v1522_v44 = vld [vmem:[%s2321_s7 + $0x30] sm:$0xff] }
 0xb9b   :  { %v943_v46 = vmul.f32 0.5, %v942_v45  ;;  %v1521_v45 = vld [vmem:[%s2321_s7 + $0x28] sm:$0xff] }
 0xb9d   :  { %v944_v47 = vsub.f32 1.5, %v943_v46  ;;  %v1520_v46 = vld [vmem:[%s2321_s7 + $0x20] sm:$0xff] }
 0xb9f   :  { %v945_v48 = vmul.f32 %v1638_v43, %v944_v47  ;;  %v1053_v47 = vlaneseq }
 0xba1   :  { %v949_v50 = vsel %vm948_vm2, %v1638_v43, %v945_v48  ;;  %v1523_v43 = vld [vmem:[%s2321_s7 + $0x38] sm:$0xff] }
 0xba2   :  { %v960_v51 = vmul.f32 %v949_v50, %v926_v30  ;;  %1259 = vmatpush.msra.mxu0 %v1523_v43 }
 0xba4   :  { %v964_v36 = vmul.f32 %v1575_v49, %v960_v51  ;;  %1260 = vmatpush.msra.mxu0 %v1522_v44 }
 0xba6   :  { %v968_v53 = vadd.f32 %v1576_v52, %v964_v36  ;;  %1261 = vmatpush.msra.mxu0 %v1521_v45  ;;  %v2082_v36 = vld [vmem:[%s2315_s1 + $0x14] ss:$0 sm:$0xff]  ;;  %v1583_v45 = vld [vmem:[%s2315_s1 + $0x16] ss:$0 sm:$0xff] }
 0xba8   :  { %1516 = vmatmul.msk.f32.vlgmr.msra.gmra.mxu3 %vm32_vm0, %v968_v53  ;;  %1262 = vmatpush.msra.mxu0 %v1520_v46 }
 0xbbd   :  { %v923_v54 = vpop.xlane.xlu1 %922 }
 0xbbe   :  { %v925_v55 = vmul.f32 %v923_v54, %v1757_v10 }
 0xbc0   :  { %v927_v56 = vsub.f32 %v2023_v35, %v925_v55 }
 0xbc2   :  { %v929_v8 = vmul.f32 %v927_v56, %v927_v56 }
 0xbc4   :  { %v933_v57 = vsel %vm32_vm0, %v929_v8, 0.0 }
 0xbc5   :  { %934 = vadd.xlane.f32.xlu1 %v933_v57 }
 0xc2b   :  { %v999_v59 = vpop.f32.mrf.mxu3 }
 0xc2c   :  { %v2053_v61 = vadd.f32 %v1577_v58, %v999_v59 }
 0xc2e   :  { %v1518_v62 = vmul.f32 -1.442695, %v2053_v61 }
 0xc30   :  { %1639 = vpow2.f32 %v1518_v62 }
 0xc36   :  { %v1640_v63 = vpop.eup %1639 }
 0xc37   :  { %v1011_v60 = vadd.f32 1.0, %v1640_v63 }
 0xc38   :  { %v935_v2 = vpop.xlane.xlu1 %934 }
 0xc39   :  { %1641 = vrcp.f32 %v1011_v60  ;;  %v937_v3 = vmul.f32 %v935_v2, %v1757_v10  ;;  %v1024_v12 = vand.u32 2147483648, %v1011_v60  ;;  %v1022_v15 = vand.u32 2147483647, %v1011_v60 }
 0xc3a   :  { %vm1018_vm4 = vweird.f32 %v1011_v60 }
 0xc3b   :  { %v939_v4 = vadd.f32 1e-05, %v937_v3  ;;  %v1025_v18 = vor.u32 1.1754944e-38, %v1024_v12  ;;  %vm1023_vm6 = vcmp.eq.f32.partialorder %v1022_v15, 8.507059e+37 }
 0xc3d   :  { %1643 = vrsqrt.f32 %v939_v4  ;;  %vm956_vm8 = vweird.f32 %v939_v4 }
 0xc3f   :  { %v1642_v5 = vpop.eup %1641 }
 0xc40   :  { %v1014_v7 = vmul.f32 %v1642_v5, %v1011_v60  ;;  %vm1019_vm3 = vweird.f32 %v1642_v5 }
 0xc41   :  { %vm1020_vm5 = vmor %vm1018_vm4, %vm1019_vm3 }
 0xc42   :  { %v1015_v9 = vsub.f32 1.0, %v1014_v7 }
 0xc43   :  { %v1644_v11 = vpop.eup %1643 }
 0xc44   :  { %v951_v13 = vmul.f32 %v1644_v11, %v939_v4  ;;  %v1016_v14 = vmul.f32 %v1642_v5, %v1015_v9  ;;  %vm957_vm7 = vweird.f32 %v1644_v11  ;;  %v1579_v9 = vld [vmem:[%s2315_s1 + $0x11] ss:$0 sm:$0xff] }
 0xc45   :  { %vm958_vm9 = vmor %vm956_vm8, %vm957_vm7 }
 0xc46   :  { %v952_v16 = vmul.f32 %v1644_v11, %v951_v13  ;;  %v1017_v17 = vadd.f32 %v1642_v5, %v1016_v14 }
 0xc48   :  { %v953_v20 = vmul.f32 0.5, %v952_v16  ;;  %v1021_v21 = vsel %vm1020_vm5, %v1642_v5, %v1017_v17  ;;  %v1580_v17 = vld [vmem:[%s2315_s1 + $0x12] ss:$0 sm:$0xff] }
 0xc49   :  { %v1026_v22 = vsel %vm1023_vm6, %v1025_v18, %v1021_v21 }
 0xc4a   :  { %v954_v23 = vsub.f32 1.5, %v953_v20  ;;  %1045 = vrot.lane.b32.xlu1 %v1026_v22, %s1684_s23 }
 0xc4c   :  { %v955_v26 = vmul.f32 %v1644_v11, %v954_v23 }
 0xc4e   :  { %v959_v0 = vsel %vm958_vm9, %v1644_v11, %v955_v26 }
 0xc4f   :  { %v961_v28 = vmul.f32 %v959_v0, %v927_v56  ;;  %v1581_v0 = vld [vmem:[%s2315_s1 + $0x13] ss:$0 sm:$0xff] }
 0xc51   :  { %v965_v29 = vmul.f32 %v1575_v49, %v961_v28  ;;  %v2072_v49 = vshrl.u32 %v1053_v47, 7 }
 0xc53   :  { %v969_v30 = vadd.f32 %v1576_v52, %v965_v29  ;;  %v1060_v51 = vand.u32 7, %v2072_v49  ;;  %v1055_v52 = vadd.s32 8, %v2072_v49  ;;  %vm1082_vm14 = vcmp.lt.s32.totalorder %v2072_v49, 3 }
 0xc54   :  { %vm1103_vm15 = vcmp.lt.s32.totalorder %v2072_v49, 2  ;;  %vm1124_vm1 = vcmp.lt.s32.totalorder %v2072_v49, 1  ;;  %vm1159_vm4 = vcmp.lt.s32.totalorder %v2072_v49, 7  ;;  %vm1180_vm7 = vcmp.lt.s32.totalorder %v2072_v49, 6 }
 0xc55   :  { %1517 = vmatmul.msk.f32.gmra.mxu3 %vm32_vm0, %v969_v30  ;;  %v1085_v55 = vadd.s32 4294967293, %v1060_v51  ;;  %v1106_v56 = vadd.s32 4294967294, %v1060_v51  ;;  %v1067_v8 = vand.u32 7, %v1055_v52  ;;  %v1127_v59 = vadd.s32 4294967295, %v1060_v51 }
 0xc56   :  { %v1183_v2 = vadd.s32 2, %v1060_v51  ;;  %v2097_v3 = vadd.s32 3, %v1060_v51  ;;  %vm1201_vm9 = vcmp.lt.s32.totalorder %v2072_v49, 5  ;;  %v1587_v49 = vld [vmem:[%s2315_s1 + $0xe] ss:$0 sm:$0xff] }
 0xc57   :  { %vm1087_vm2 = vcmp.ge.s32.totalorder %v1085_v55, 0  ;;  %vm1108_vm3 = vcmp.ge.s32.totalorder %v1106_v56, 0  ;;  %v1086_v5 = vadd.s32 4294967293, %v1067_v8  ;;  %vm1129_vm5 = vcmp.ge.s32.totalorder %v1127_v59, 0  ;;  %v1584_v55 = vld [vmem:[%s2315_s1 + $0x17] ss:$0 sm:$0xff] }
 0xc58   :  { %vm1187_vm8 = vcmp.lt.s32.totalorder %v1183_v2, 8  ;;  %v1107_v11 = vadd.s32 4294967294, %v1067_v8  ;;  %v1128_v12 = vadd.s32 4294967295, %v1067_v8  ;;  %v1163_v20 = vadd.s32 1, %v1067_v8 }
 0xc59   :  { %v1184_v21 = vadd.s32 2, %v1067_v8 }
 0xcbc   :  { %v1046_v48 = vpop.permute.xlu1 %1045 }
 0xcbd   :  { %v2075_v50 = vmul.f32 %v1046_v48, %v2053_v61  ;;  %v1162_v61 = vadd.s32 1, %v1060_v51 }
 0xcbf   :  { %v1080_v53 = vrot.slane %v2075_v50, 5  ;;  %v1101_v54 = vrot.slane %v2075_v50, 6  ;;  %v1122_v57 = vrot.slane %v2075_v50, 7  ;;  %v1157_v62 = vrot.slane %v2075_v50, 1 }
 0xcc0   :  { %v1178_v63 = vrot.slane %v2075_v50, 2  ;;  %v1199_v60 = vrot.slane %v2075_v50, 3  ;;  %vm1166_vm6 = vcmp.lt.s32.totalorder %v1162_v61, 8 }
 0xcd8   :  { %v1002_v31 = vpop.f32.mrf.mxu3 }
 0xcd9   :  { %v1003_v32 = vadd.f32 %v1577_v58, %v1002_v31  ;;  %v2089_v58 = vmul.f32 %v2082_v36, %v2075_v50 }
 0xcdb   :  { %v1519_v1 = vmul.f32 -1.442695, %v1003_v32 }
 0xcdd   :  { %1645 = vpow2.f32 %v1519_v1 }
 0xce3   :  { %v1646_v19 = vpop.eup %1645 }
 0xce4   :  { %v1012_v33 = vadd.f32 1.0, %v1646_v19 }
 0xce6   :  { %1647 = vrcp.f32 %v1012_v33  ;;  %v1039_v38 = vand.u32 2147483648, %v1012_v33  ;;  %v1037_v24 = vand.u32 2147483647, %v1012_v33  ;;  %vm1033_vm11 = vweird.f32 %v1012_v33 }
 0xce8   :  { %v1040_v6 = vor.u32 1.1754944e-38, %v1039_v38  ;;  %vm1038_vm13 = vcmp.eq.f32.partialorder %v1037_v24, 8.507059e+37 }
 0xcec   :  { %v1648_v34 = vpop.eup %1647 }
 0xced   :  { %v1029_v27 = vmul.f32 %v1648_v34, %v1012_v33  ;;  %vm1034_vm10 = vweird.f32 %v1648_v34  ;;  %v1205_v33 = vadd.s32 3, %v1067_v8 }
 0xcee   :  { %vm1035_vm12 = vmor %vm1033_vm11, %vm1034_vm10  ;;  %vm1208_vm10 = vcmp.lt.s32.totalorder %v2097_v3, 8  ;;  %vm1088_vm11 = vcmp.ge.s32.totalorder %v1086_v5, 0  ;;  %v1585_v3 = vld [vmem:[%s2315_s1 + $0xc] ss:$0 sm:$0xff] }
 0xcef   :  { %v1030_v37 = vsub.f32 1.0, %v1029_v27  ;;  %v1582_v27 = vld [vmem:[%s2315_s1 + $0x15] ss:$0 sm:$0xff] }
 0xcf1   :  { %v1031_v39 = vmul.f32 %v1648_v34, %v1030_v37 }
 0xcf3   :  { %v1032_v40 = vadd.f32 %v1648_v34, %v1031_v39 }
 0xcf5   :  { %v1036_v41 = vsel %vm1035_vm12, %v1648_v34, %v1032_v40  ;;  %vm1109_vm12 = vcmp.ge.s32.totalorder %v1107_v11, 0 }
 0xcf6   :  { %v1041_v42 = vsel %vm1038_vm13, %v1040_v6, %v1036_v41  ;;  %vm1130_vm13 = vcmp.ge.s32.totalorder %v1128_v12, 0 }
 0xcf7   :  { %1047 = vrot.lane.b32.xlu2 %v1041_v42, %s1684_s23 }
 0xd51   :  { %v1048_v4 = vpop.permute.xlu2 %1047 }
 0xd52   :  { %v2100_v7 = vmul.f32 %v1048_v4, %v1003_v32 }
 0xd54   :  { %v1081_v13 = vrot.slane %v2100_v7, 5  ;;  %v1102_v14 = vrot.slane %v2100_v7, 6  ;;  %v1123_v15 = vrot.slane %v2100_v7, 7  ;;  %v1158_v16 = vrot.slane %v2100_v7, 1 }
 0xd55   :  { %v1179_v18 = vrot.slane %v2100_v7, 2  ;;  %v1200_v31 = vrot.slane %v2100_v7, 3  ;;  %v1154_v61 = vmul.f32 %v2082_v36, %v2100_v7 }
 0xd56   :  { %v1084_v22 = vsel %vm1082_vm14, %v1081_v13, %v1080_v53  ;;  %v1105_v23 = vsel %vm1103_vm15, %v1102_v14, %v1101_v54  ;;  %v1126_v26 = vsel %vm1124_vm1, %v1123_v15, %v1122_v57  ;;  %v1160_v28 = vsel %vm1159_vm4, %v1157_v62, %v1158_v16 }
 0xd57   :  { %v1093_v29 = vsel %vm1087_vm2, %v1084_v22, 0.0  ;;  %v1114_v30 = vsel %vm1108_vm3, %v1105_v23, 0.0  ;;  %v1135_v32 = vsel %vm1129_vm5, %v1126_v26, 0.0  ;;  %v1170_v34 = vsel %vm1166_vm6, %v1160_v28, 0.0 }
 0xd58   :  { %v1097_v1 = vmul.f32 %v1579_v9, %v1093_v29  ;;  %v1118_v19 = vmul.f32 %v1580_v17, %v1114_v30  ;;  %v1083_v37 = vsel %vm1082_vm14, %v1080_v53, %v1081_v13  ;;  %v1104_v38 = vsel %vm1103_vm15, %v1101_v54, %v1102_v14  ;;  %v1586_v14 = vld [vmem:[%s2315_s1 + $0xd] ss:$0 sm:$0xff]  ;;  %v1588_v29 = vld [vmem:[%s2315_s1 + $0xf] ss:$0 sm:$0xff] }
 0xd59   :  { %v1139_v24 = vmul.f32 %v1581_v0, %v1135_v32  ;;  %v1181_v40 = vsel %vm1180_vm7, %v1178_v63, %v1179_v18  ;;  %v1094_v6 = vsel %vm1088_vm11, %v1083_v37, 0.0  ;;  %v1202_v41 = vsel %vm1201_vm9, %v1199_v60, %v1200_v31 }
 0xd5a   :  { %v1120_v39 = vadd.f32 %v1118_v19, %v1097_v1  ;;  %v1098_v42 = vmul.f32 %v1579_v9, %v1094_v6  ;;  %v1115_v43 = vsel %vm1109_vm12, %v1104_v38, 0.0  ;;  %vm1167_vm14 = vcmp.lt.s32.totalorder %v1163_v20, 8 }
 0xd5b   :  { %v1119_v46 = vmul.f32 %v1580_v17, %v1115_v43  ;;  %v1125_v47 = vsel %vm1124_vm1, %v1122_v57, %v1123_v15  ;;  %v1161_v48 = vsel %vm1159_vm4, %v1158_v16, %v1157_v62  ;;  %v1174_v51 = vmul.f32 %v1582_v27, %v1170_v34  ;;  %v1529_v43 = vld [vmem:[%s2317_s3 + $0x38] sm:$0xff] }
 0xd5c   :  { %v1141_v44 = vadd.f32 %v1139_v24, %v1120_v39  ;;  %v1191_v52 = vsel %vm1187_vm8, %v1181_v40, 0.0  ;;  %v1136_v53 = vsel %vm1130_vm13, %v1125_v47, 0.0  ;;  %vm1188_vm15 = vcmp.lt.s32.totalorder %v1184_v21, 8  ;;  %1367 = vmatpush.msra.mxu1 %v1529_v43 }
 0xd5d   :  { %v1121_v56 = vadd.f32 %v1119_v46, %v1098_v42  ;;  %v1140_v8 = vmul.f32 %v1581_v0, %v1136_v53  ;;  %v1182_v57 = vsel %vm1180_vm7, %v1179_v18, %v1178_v63  ;;  %v1212_v59 = vsel %vm1208_vm10, %v1202_v41, 0.0  ;;  %v1544_v53 = vld [vmem:[%s2318_s4 + $0xf0] sm:$0xff] }
 0xd5e   :  { %v1155_v54 = vadd.f32 %v2089_v58, %v1141_v44  ;;  %v1171_v62 = vsel %vm1167_vm14, %v1161_v48, 0.0  ;;  %vm1209_vm1 = vcmp.lt.s32.totalorder %v1205_v33, 8  ;;  %v1195_v2 = vmul.f32 %v1583_v45, %v1191_v52  ;;  %v1528_v44 = vld [vmem:[%s2317_s3 + $0x30] sm:$0xff]  ;;  %v1526_v48 = vld [vmem:[%s2317_s3 + $0x20] sm:$0xff]  ;;  %v1545_v52 = vld [vmem:[%s2318_s4 + $0xf8] sm:$0xff] }
 0xd5f   :  { %v1142_v4 = vadd.f32 %v1140_v8, %v1121_v56  ;;  %v1203_v5 = vsel %vm1201_vm9, %v1200_v31, %v1199_v60  ;;  %v1192_v9 = vsel %vm1188_vm15, %v1182_v57, 0.0  ;;  %v1216_v63 = vmul.f32 %v1584_v55, %v1212_v59  ;;  %1368 = vmatpush.msra.mxu1 %v1528_v44  ;;  %1381 = vmatpush.msra.mxu2 %v1545_v52  ;;  %v1542_v8 = vld [vmem:[%s2318_s4 + $0xe0] sm:$0xff] }
 0xd60   :  { %v1176_v58 = vadd.f32 %v1174_v51, %v1155_v54  ;;  %v1175_v36 = vmul.f32 %v1582_v27, %v1171_v62  ;;  %v1213_v7 = vsel %vm1209_vm1, %v1203_v5, 0.0  ;;  %v1196_v50 = vmul.f32 %v1583_v45, %v1192_v9  ;;  %v1527_v45 = vld [vmem:[%s2317_s3 + $0x28] sm:$0xff]  ;;  %v1538_v9 = vld [vmem:[%s2318_s4 + $0xc0] sm:$0xff] }
 0xd61   :  { %v1156_v12 = vadd.f32 %v1154_v61, %v1142_v4  ;;  %v1217_v17 = vmul.f32 %v1584_v55, %v1213_v7  ;;  %1369 = vmatpush.msra.mxu1 %v1527_v45  ;;  %v1543_v54 = vld [vmem:[%s2318_s4 + $0xe8] sm:$0xff]  ;;  %1382 = vmatpush.msra.mxu2 %v1544_v53  ;;  %v1541_v61 = vld [vmem:[%s2318_s4 + $0xd8] sm:$0xff]  ;;  %v1589_v7 = vld [vmem:[%s2315_s1 + $0x6] ss:$0 sm:$0xff] }
 0xd62   :  { %v1197_v11 = vadd.f32 %v1195_v2, %v1176_v58  ;;  %v1540_v58 = vld [vmem:[%s2318_s4 + $0xd0] sm:$0xff]  ;;  %v1539_v4 = vld [vmem:[%s2318_s4 + $0xc8] sm:$0xff] }
 0xd63   :  { %v1177_v15 = vadd.f32 %v1175_v36, %v1156_v12  ;;  %1370 = vmatpush.msra.mxu1 %v1526_v48  ;;  %1383 = vmatpush.msra.mxu2 %v1543_v54 }
 0xd64   :  { %v1218_v13 = vadd.f32 %v1216_v63, %v1197_v11 }
 0xd65   :  { %v1198_v60 = vadd.f32 %v1196_v50, %v1177_v15  ;;  %1384 = vmatpush.msra.mxu2 %v1542_v8 }
 0xd66   :  { %v1222_v16 = vadd.f32 %v1585_v3, %v1218_v13  ;;  %v1536_v13 = vld [vmem:[%s2318_s4 + $0xb0] sm:$0xff] }
 0xd67   :  { %v1219_v20 = vadd.f32 %v1217_v17, %v1198_v60  ;;  %1385 = vmatpush.msra.mxu2 %v1541_v61 }
 0xd68   :  { %v1226_v18 = vmul.f32 %v1586_v14, %v1222_v16  ;;  %v1590_v16 = vld [vmem:[%s2315_s1 + $0x7] ss:$0 sm:$0xff] }
 0xd69   :  { %v1223_v22 = vadd.f32 %v1585_v3, %v1219_v20  ;;  %1386 = vmatpush.msra.mxu2 %v1540_v58  ;;  %v1537_v3 = vld [vmem:[%s2318_s4 + $0xb8] sm:$0xff] }
 0xd6a   :  { %v1230_v21 = vadd.f32 %v1587_v49, %v1226_v18  ;;  %v1534_v18 = vld [vmem:[%s2318_s4 + $0xa0] sm:$0xff] }
 0xd6b   :  { %v1227_v26 = vmul.f32 %v1586_v14, %v1223_v22  ;;  %1387 = vmatpush.msra.mxu2 %v1539_v4  ;;  %v1533_v22 = vld [vmem:[%s2318_s4 + $0x98] sm:$0xff] }
 0xd6c   :  { %v1232_v23 = vmax.f32 %v1230_v21, 0.0 }
 0xd6d   :  { %v1231_v0 = vadd.f32 %v1587_v49, %v1227_v26  ;;  %1388 = vmatpush.msra.mxu2 %v1538_v9  ;;  %v1535_v49 = vld [vmem:[%s2318_s4 + $0xa8] sm:$0xff] }
 0xd6e   :  { %1524 = vmatmul.msk.f32.vlgmr.msra.gmra.mxu0 %vm32_vm0, %v1232_v23 }
 0xd6f   :  { %v1233_v28 = vmax.f32 %v1231_v0, 0.0  ;;  %1389 = vmatpush.msra.mxu2 %v1537_v3 }
 0xd71   :  { %1390 = vmatpush.msra.mxu2 %v1536_v13 }
 0xd73   :  { %1391 = vmatpush.msra.mxu2 %v1535_v49 }
 0xd75   :  { %1392 = vmatpush.msra.mxu2 %v1534_v18 }
 0xd76   :  { %1525 = vmatmul.msk.f32.gmra.mxu0 %vm32_vm0, %v1233_v28 }
 0xd77   :  { %1393 = vmatpush.msra.mxu2 %v1533_v22 }
 0xdeb   :  { %v1264_v30 = vpop.f32.mrf.mxu0 }
 0xdec   :  { %v1265_v31 = vadd.f32 %v1588_v29, %v1264_v30  ;;  %v1532_v30 = vld [vmem:[%s2318_s4 + $0x90] sm:$0xff] }
 0xded   :  { %1394 = vmatpush.msra.mxu2 %v1532_v30 }
 0xdee   :  { %v2197_v32 = vadd.f32 %v1265_v31, %v2014_v25  ;;  %v1531_v31 = vld [vmem:[%s2318_s4 + $0x88] sm:$0xff] }
 0xdef   :  { %1395 = vmatpush.msra.mxu2 %v1531_v31 }
 0xdf0   :  { %v1272_v1 = vsel %vm32_vm0, %v2197_v32, 0.0 }
 0xdf1   :  { %1273 = vadd.xlane.f32.xlu1 %v1272_v1  ;;  %v1530_v1 = vld [vmem:[%s2318_s4 + $0x80] sm:$0xff] }
 0xdf2   :  { %1396 = vmatpush.msra.mxu2 %v1530_v1 }
 0xdf3   :  { %v1267_v19 = vpop.f32.mrf.mxu0 }
 0xdf4   :  { %v1268_v33 = vadd.f32 %v1588_v29, %v1267_v19  ;;  %v1591_v19 = vld [vmem:[%s2316_s2 + $0x1] ss:$0 sm:$0xff] }
 0xdf6   :  { %v2202_v34 = vadd.f32 %v1268_v33, %v2023_v35 }
 0xdf8   :  { %v1275_v27 = vsel %vm32_vm0, %v2202_v34, 0.0 }
 0xdf9   :  { %1276 = vadd.xlane.f32.xlu0 %v1275_v27 }
 0xe64   :  { %v1274_v37 = vpop.xlane.xlu1 %1273 }
 0xe65   :  { %v1278_v38 = vmul.f32 %v1274_v37, %v1757_v10 }
 0xe67   :  { %v1280_v39 = vsub.f32 %v2197_v32, %v1278_v38 }
 0xe69   :  { %v1282_v25 = vmul.f32 %v1280_v39, %v1280_v39 }
 0xe6b   :  { %v1284_v24 = vsel %vm32_vm0, %v1282_v25, 0.0 }
 0xe6c   :  { %1285 = vadd.xlane.f32.xlu2 %v1284_v24  ;;  %v1277_v40 = vpop.xlane.xlu0 %1276  ;;  %v1592_v24 = vld [vmem:[%s2315_s1 + $0x10] ss:$0 sm:$0xff] }
 0xe6d   :  { %v1279_v6 = vmul.f32 %v1277_v40, %v1757_v10 }
 0xe6f   :  { %v2211_v41 = vsub.f32 %v2202_v34, %v1279_v6 }
 0xe71   :  { %v1283_v35 = vmul.f32 %v2211_v41, %v2211_v41 }
 0xe73   :  { %v1287_v42 = vsel %vm32_vm0, %v1283_v35, 0.0 }
 0xe74   :  { %1288 = vadd.xlane.f32.xlu0 %v1287_v42 }
 0xedf   :  { %v1286_v46 = vpop.xlane.xlu2 %1285 }
 0xee0   :  { %v1290_v47 = vmul.f32 %v1286_v46, %v1757_v10 }
 0xee2   :  { %v1292_v51 = vadd.f32 1e-05, %v1290_v47 }
 0xee4   :  { %1649 = vrsqrt.f32 %v1292_v51  ;;  %vm1300_vm3 = vweird.f32 %v1292_v51 }
 0xee7   :  { %v1289_v55 = vpop.xlane.xlu0 %1288 }
 0xee8   :  { %v1291_v56 = vmul.f32 %v1289_v55, %v1757_v10 }
 0xeea   :  { %v1650_v57 = vpop.eup %1649  ;;  %v1293_v59 = vadd.f32 1e-05, %v1291_v56 }
 0xeeb   :  { %v1295_v62 = vmul.f32 %v1650_v57, %v1292_v51  ;;  %vm1301_vm2 = vweird.f32 %v1650_v57 }
 0xeec   :  { %1651 = vrsqrt.f32 %v1293_v59  ;;  %vm1302_vm4 = vmor %vm1300_vm3, %vm1301_vm2  ;;  %vm1310_vm6 = vweird.f32 %v1293_v59 }
 0xeed   :  { %v1296_v2 = vmul.f32 %v1650_v57, %v1295_v62 }
 0xeef   :  { %v1297_v5 = vmul.f32 0.5, %v1296_v2 }
 0xef1   :  { %v1298_v11 = vsub.f32 1.5, %v1297_v5 }
 0xef2   :  { %v1652_v63 = vpop.eup %1651 }
 0xef3   :  { %v1299_v12 = vmul.f32 %v1650_v57, %v1298_v11  ;;  %v1305_v36 = vmul.f32 %v1652_v63, %v1293_v59  ;;  %vm1311_vm5 = vweird.f32 %v1652_v63 }
 0xef4   :  { %vm1312_vm7 = vmor %vm1310_vm6, %vm1311_vm5 }
 0xef5   :  { %v1303_v14 = vsel %vm1302_vm4, %v1650_v57, %v1299_v12  ;;  %v1306_v15 = vmul.f32 %v1652_v63, %v1305_v36 }
 0xef6   :  { %v1314_v50 = vmul.f32 %v1303_v14, %v1280_v39 }
 0xef7   :  { %v1307_v60 = vmul.f32 0.5, %v1306_v15  ;;  %v1594_v15 = vld [vmem:[%s2315_s1 + $0x9] ss:$0 sm:$0xff] }
 0xef8   :  { %v1318_v17 = vmul.f32 %v1589_v7, %v1314_v50 }
 0xef9   :  { %v1308_v20 = vsub.f32 1.5, %v1307_v60 }
 0xefa   :  { %v1322_v21 = vadd.f32 %v1590_v16, %v1318_v17 }
 0xefb   :  { %v1309_v23 = vmul.f32 %v1652_v63, %v1308_v20 }
 0xefc   :  { %1546 = vmatmul.msk.f32.vlgmr.msra.gmra.mxu1 %vm32_vm0, %v1322_v21 }
 0xefd   :  { %v1313_v26 = vsel %vm1312_vm7, %v1652_v63, %v1309_v23 }
 0xefe   :  { %v1315_v0 = vmul.f32 %v1313_v26, %v2211_v41 }
 0xf00   :  { %v1319_v28 = vmul.f32 %v1589_v7, %v1315_v0  ;;  %v1593_v7 = vld [vmem:[%s2315_s1 + $0x8] ss:$0 sm:$0xff]  ;;  %s1696_s1 = smov 128  }
 0xf02   :  { %v1323_v29 = vadd.f32 %v1590_v16, %v1319_v28 }
 0xf04   :  { %1547 = vmatmul.msk.f32.gmra.mxu1 %vm32_vm0, %v1323_v29 }
 0xf79   :  { %v1372_v33 = vpop.f32.mrf.mxu1 }
 0xf7a   :  { %v1373_v27 = vadd.f32 %v1591_v19, %v1372_v33 }
 0xf7c   :  { %v1378_v37 = vmax.f32 %v1373_v27, 0.0 }
 0xf7e   :  { %1397 = vmatmul.f32.vlgmr.msra.gmra.mxu2 %v1378_v37 }
 0xf81   :  { %v1375_v38 = vpop.f32.mrf.mxu1 }
 0xf82   :  { %v1376_v39 = vadd.f32 %v1591_v19, %v1375_v38 }
 0xf84   :  { %v1379_v25 = vmax.f32 %v1376_v39, 0.0 }
 0xf86   :  { %1400 = vmatmul.f32.gmra.mxu2 %v1379_v25 }
0x1001   :  { %v1398_v40 = vpop.f32.mrf.mxu2 }
0x1002   :  { %v1399_v6 = vadd.f32 %v1592_v24, %v1398_v40 }
0x1004   :  { %v1404_v41 = vmul.f32 0.5, %v1399_v6 }
0x1006   :  { %v1406_v35 = vadd.f32 %v1404_v41, %v2197_v32 }
0x1008   :  { %v1408_v42 = vsel %vm32_vm0, %v1406_v35, 0.0 }
0x1009   :  { %1409 = vadd.xlane.f32.xlu0 %v1408_v42  ;;  %v1401_v43 = vpop.f32.mrf.mxu2 }
0x100a   :  { %v1402_v44 = vadd.f32 %v1592_v24, %v1401_v43 }
0x100c   :  { %v1405_v45 = vmul.f32 0.5, %v1402_v44 }
0x100e   :  { %v1407_v46 = vadd.f32 %v1405_v45, %v2202_v34 }
0x1010   :  { %v1411_v47 = vsel %vm32_vm0, %v1407_v46, 0.0 }
0x1011   :  { %1412 = vadd.xlane.f32.xlu0 %v1411_v47 }
0x107c   :  { %v1410_v48 = vpop.xlane.xlu0 %1409 }
0x107d   :  { %v1414_v51 = vmul.f32 %v1410_v48, %v1757_v10 }
0x107f   :  { %v1416_v52 = vsub.f32 %v1406_v35, %v1414_v51 }
0x1081   :  { %v1418_v53 = vmul.f32 %v1416_v52, %v1416_v52 }
0x1083   :  { %v1420_v54 = vsel %vm32_vm0, %v1418_v53, 0.0 }
0x1084   :  { %1421 = vadd.xlane.f32.xlu0 %v1420_v54  ;;  %v1413_v32 = vpop.xlane.xlu0 %1412 }
0x1085   :  { %v1415_v55 = vmul.f32 %v1413_v32, %v1757_v10 }
0x1087   :  { %v1417_v56 = vsub.f32 %v1407_v46, %v1415_v55 }
0x1089   :  { %v1419_v8 = vmul.f32 %v1417_v56, %v1417_v56 }
0x108b   :  { %v1423_v57 = vsel %vm32_vm0, %v1419_v8, 0.0 }
0x108c   :  { %1424 = vadd.xlane.f32.xlu1 %v1423_v57 }
0x10f7   :  { %v1422_v34 = vpop.xlane.xlu0 %1421 }
0x10f8   :  { %v1426_v59 = vmul.f32 %v1422_v34, %v1757_v10 }
0x10fa   :  { %v1428_v61 = vadd.f32 1e-05, %v1426_v59 }
0x10fc   :  { %1653 = vrsqrt.f32 %v1428_v61  ;;  %vm1436_vm9 = vweird.f32 %v1428_v61 }
0x10ff   :  { %v1425_v62 = vpop.xlane.xlu1 %1424 }
0x1100   :  { %v1427_v58 = vmul.f32 %v1425_v62, %v1757_v10 }
0x1102   :  { %v1654_v2 = vpop.eup %1653  ;;  %v1429_v4 = vadd.f32 1e-05, %v1427_v58 }
0x1103   :  { %v1431_v5 = vmul.f32 %v1654_v2, %v1428_v61  ;;  %vm1437_vm8 = vweird.f32 %v1654_v2 }
0x1104   :  { %1655 = vrsqrt.f32 %v1429_v4  ;;  %vm1438_vm10 = vmor %vm1436_vm9, %vm1437_vm8  ;;  %vm1446_vm12 = vweird.f32 %v1429_v4 }
0x1105   :  { %v1432_v9 = vmul.f32 %v1654_v2, %v1431_v5 }
0x1107   :  { %v1433_v11 = vmul.f32 0.5, %v1432_v9 }
0x1109   :  { %v1434_v63 = vsub.f32 1.5, %v1433_v11 }
0x110a   :  { %v1656_v3 = vpop.eup %1655 }
0x110b   :  { %v1435_v12 = vmul.f32 %v1654_v2, %v1434_v63  ;;  %v1441_v36 = vmul.f32 %v1656_v3, %v1429_v4  ;;  %vm1447_vm11 = vweird.f32 %v1656_v3 }
0x110c   :  { %vm1448_vm13 = vmor %vm1446_vm12, %vm1447_vm11 }
0x110d   :  { %v1439_v13 = vsel %vm1438_vm10, %v1654_v2, %v1435_v12  ;;  %v1442_v14 = vmul.f32 %v1656_v3, %v1441_v36 }
0x110e   :  { %v1450_v10 = vmul.f32 %v1439_v13, %v1416_v52 }
0x110f   :  { %v1443_v50 = vmul.f32 0.5, %v1442_v14 }
0x1110   :  { %v1454_v16 = vmul.f32 %v1593_v7, %v1450_v10 }
0x1111   :  { %v1444_v49 = vsub.f32 1.5, %v1443_v50 }
0x1112   :  { %v1458_v60 = vadd.f32 %v1594_v15, %v1454_v16 }
0x1113   :  { %v1445_v17 = vmul.f32 %v1656_v3, %v1444_v49 }
0x1114   :  { %1460 = vst.msk [vmem:[#allocation2] sm:$0xff] %vm32_vm0, %v1458_v60 }
0x1115   :  { %v1449_v18 = vsel %vm1448_vm13, %v1656_v3, %v1445_v17 }
0x1116   :  { %v1451_v20 = vmul.f32 %v1449_v18, %v1417_v56 }
0x1118   :  { %v1455_v21 = vmul.f32 %v1593_v7, %v1451_v20 }
0x111a   :  { %v1459_v22 = vadd.f32 %v1594_v15, %v1455_v21 }
0x111c   :  { %1461 = vst.msk [vmem:[#allocation2 + $0x8] sm:$0xff] %vm32_vm0, %v1459_v22 }
0x111d   :  { %1474 = dma.vmem_to_hbm [thread:$0]  %s1467_s12, 256, %s1469_s15, [#allocation3], %s1696_s1, %s1696_s1, %s1697_s16  }
0x111e   :  { %1681 = dma.done.wait [#allocation3], 256  }
0x111f   :  { %1682 = vsyncadd [#allocation3], 4294967040 }
0x1120   :  { %1479 = vsyncpa [#allocation3], 1 }

</bundles_post_ra>
